<compile_context>
chip_gen: v5e
topology: v5e:2x2
jax: 0.10.0
libtpu: 0.0.40
codegen_flags: <defaults>
</compile_context>

<pallas_src>
import functools
import math

import jax
import jax.numpy as jnp
from jax.experimental import pallas as pl
from jax.experimental.pallas import tpu as pltpu

# ----------------------------- config (synthetic) -----------------------------
HID_DIM = 32
NUM_LAYERS = 3
BN_EPS = 1e-5
FPAD = 128      # lane-dense padding of all feature dims
TILE_M = 128    # A_hat row tile         (raise to 512 for big graphs on v7x)
TILE_K = 128    # A_hat contraction tile (raise to 1024 for big graphs on v7x)


# ------------------------------- fused kernel ---------------------------------
def gcn_fused_kernel(a_ref, x_ref, w_ref, b_ref, g_ref, be_ref, o_ref,
                     h_ref, xw_ref, acc_ref, *, n_real):
    l = pl.program_id(0)          # layer index
    i = pl.program_id(1)          # node-row tile
    k = pl.program_id(2)          # contraction (neighbor) tile
    ni = pl.num_programs(1)
    nk = pl.num_programs(2)
    n_layers = pl.num_programs(0)

    tm, tk = a_ref.shape          # (TILE_M, TILE_K)
    n_pad, fpad = h_ref.shape

    row0 = pl.multiple_of(i * tm, tm)
    col0 = pl.multiple_of(k * tk, tk)

    # ---- layer prologue: XW = H @ W_l (computed once per layer, bf16 MXU) ----
    @pl.when((i == 0) & (k == 0))
    def _():
        @pl.when(l == 0)
        def _():
            h_ref[...] = x_ref[...]
        xw_ref[...] = jnp.dot(
            h_ref[...].astype(jnp.bfloat16), w_ref[...].astype(jnp.bfloat16),
            preferred_element_type=jnp.float32).astype(xw_ref.dtype)

    # ---- A_hat @ XW, accumulated over K tiles in f32 --------------------------
    @pl.when(k == 0)
    def _():
        acc_ref[...] = jnp.broadcast_to(b_ref[...], (tm, fpad))   # GCNConv bias

    acc_ref[...] += jnp.dot(a_ref[...], xw_ref[pl.ds(col0, tk), :],
                            preferred_element_type=jnp.float32)

    @pl.when(k == nk - 1)
    def _():
        # h_ref was fully consumed into xw_ref in the prologue -> safe to
        # overwrite row-tile i in place with this layer's conv output.
        h_ref[pl.ds(row0, tm), :] = acc_ref[...]

    # ---- layer epilogue: full-batch BatchNorm + ReLU, or final output --------
    @pl.when((i == ni - 1) & (k == nk - 1))
    def _():
        @pl.when(l < n_layers - 1)
        def _():
            h = h_ref[...]
            # Full-batch (training-mode, biased) BatchNorm1d over the REAL rows
            # only; padded rows are masked out of the statistics.
            mask = (jax.lax.broadcasted_iota(jnp.int32, (n_pad, 1), 0)
                    < n_real).astype(jnp.float32)
            inv_n = 1.0 / float(n_real)
            mean = jnp.sum(h * mask, axis=0, keepdims=True) * inv_n
            cent = h - mean
            var = jnp.sum(cent * cent * mask, axis=0, keepdims=True) * inv_n
            hn = cent * jax.lax.rsqrt(var + BN_EPS) * g_ref[...] + be_ref[...]
            # Dropout(p=0.3) is identity in eval mode; then ReLU; zero pad rows.
            h_ref[...] = jnp.maximum(hn, 0.0) * mask

        @pl.when(l == n_layers - 1)
        def _():
            o_ref[...] = h_ref[...]


# --------------------------------- wrapper ------------------------------------
@functools.partial(jax.jit, static_argnames=("n_real", "out_dim"))
def gcn_forward(a_hat_pad, x_pad, w_stack, b_stack, g_stack, be_stack, *,
                n_real, out_dim):
    n_pad = a_hat_pad.shape[0]
    fpad = x_pad.shape[1]
    n_layers = w_stack.shape[0]
    tm, tk = TILE_M, TILE_K
    grid = (n_layers, n_pad // tm, n_pad // tk)

    out_pad = pl.pallas_call(
        functools.partial(gcn_fused_kernel, n_real=n_real),
        out_shape=jax.ShapeDtypeStruct((n_pad, fpad), jnp.float32),
        grid=grid,
        in_specs=[
            pl.BlockSpec((tm, tk), lambda l, i, k: (i, k)),               # A_hat tile (bf16)
            pl.BlockSpec((n_pad, fpad), lambda l, i, k: (0, 0)),          # X (fetched once)
            pl.BlockSpec((None, fpad, fpad), lambda l, i, k: (l, 0, 0)),  # W_l
            pl.BlockSpec((None, 1, fpad), lambda l, i, k: (l, 0, 0)),     # b_l
            pl.BlockSpec((None, 1, fpad), lambda l, i, k: (l, 0, 0)),     # gamma_l
            pl.BlockSpec((None, 1, fpad), lambda l, i, k: (l, 0, 0)),     # beta_l
        ],
        out_specs=pl.BlockSpec((n_pad, fpad), lambda l, i, k: (0, 0)),
        scratch_shapes=[
            pltpu.VMEM((n_pad, fpad), jnp.float32),    # H (layer activations, resident)
            pltpu.VMEM((n_pad, fpad), jnp.bfloat16),   # XW = H @ W_l (bf16 for MXU)
            pltpu.VMEM((tm, fpad), jnp.float32),       # per-row-tile f32 accumulator
        ],
        compiler_params=pltpu.CompilerParams(
            # layer & K axes are sequential dependencies; the row axis reads the
            # shared VMEM-resident H / BN stats, so it cannot be core-sharded.
            dimension_semantics=("arbitrary", "arbitrary", "arbitrary"),
            vmem_limit_bytes=48 * 1024 * 1024,   # headroom under v7x's 64 MiB VMEM
        ),
    )(a_hat_pad, x_pad, w_stack, b_stack, g_stack, be_stack)
    return out_pad[:n_real, :out_dim]


# --------------------------- graph preprocessing (glue) ------------------------
def normalized_adjacency(edge_index, num_nodes):
    """Dense D^{-1/2} (A + I) D^{-1/2}, as PyG GCNConv's gcn_norm.

    Note: duplicate (src, dst) pairs accumulate (same as non-coalesced PyG)."""
    src, dst = edge_index[0], edge_index[1]
    loop = jnp.arange(num_nodes, dtype=edge_index.dtype)
    src = jnp.concatenate([src, loop])
    dst = jnp.concatenate([dst, loop])
    a = jnp.zeros((num_nodes, num_nodes), jnp.float32).at[dst, src].add(1.0)
    deg = jnp.sum(a, axis=1)
    dinv = jnp.where(deg > 0.0, 1.0 / jnp.sqrt(deg), 0.0)
    return dinv[:, None] * a * dinv[None, :]


def pad_graph(a_hat, x, fpad=FPAD, tm=TILE_M, tk=TILE_K):
    n, f_in = x.shape
    step = math.lcm(tm, tk)
    n_pad = pl.cdiv(n, step) * step
    a_pad = jnp.zeros((n_pad, n_pad), jnp.float32).at[:n, :n].set(a_hat)
    a_pad = a_pad.astype(jnp.bfloat16)   # halve HBM traffic of the O(N^2) operand
    x_pad = jnp.zeros((n_pad, fpad), jnp.float32).at[:n, :f_in].set(x)
    return a_pad, x_pad


# ------------------------------- parameter init --------------------------------
def glorot(key, fan_in, fan_out):
    limit = jnp.sqrt(6.0 / (fan_in + fan_out))
    return jax.random.uniform(key, (fan_in, fan_out), jnp.float32, -limit, limit)


def init_params(key, in_dim, hid_dim=HID_DIM, out_dim=2, layers=NUM_LAYERS):
    dims = [in_dim] + [hid_dim] * (layers - 1) + [out_dim]
    params = {"w": [], "b": [], "gamma": [], "beta": []}
    keys = jax.random.split(key, layers)
    for li in range(layers):
        params["w"].append(glorot(keys[li], dims[li], dims[li + 1]))
        params["b"].append(jnp.zeros((dims[li + 1],), jnp.float32))
    for _ in range(layers - 1):
        params["gamma"].append(jnp.ones((hid_dim,), jnp.float32))
        params["beta"].append(jnp.zeros((hid_dim,), jnp.float32))
    return params


def pack_params(params, fpad=FPAD):
    """Zero-pad all per-layer params to lane-dense 128 and stack on a layer axis."""
    n_layers = len(params["w"])
    w_stack = jnp.zeros((n_layers, fpad, fpad), jnp.float32)
    b_stack = jnp.zeros((n_layers, 1, fpad), jnp.float32)
    g_stack = jnp.zeros((n_layers, 1, fpad), jnp.float32)
    be_stack = jnp.zeros((n_layers, 1, fpad), jnp.float32)
    for li in range(n_layers):
        w, b = params["w"][li], params["b"][li]
        assert w.shape[0] <= fpad and w.shape[1] <= fpad
        w_stack = w_stack.at[li, :w.shape[0], :w.shape[1]].set(w)
        b_stack = b_stack.at[li, 0, :b.shape[0]].set(b)
    for li in range(n_layers - 1):
        g, be = params["gamma"][li], params["beta"][li]
        g_stack = g_stack.at[li, 0, :g.shape[0]].set(g)
        be_stack = be_stack.at[li, 0, :be.shape[0]].set(be)
    return w_stack, b_stack, g_stack, be_stack


# ---------------------------- pure-JAX reference -------------------------------
def gcn_reference(a_hat, x, params):
    """Mirrors the kernel's dtype handling (bf16 A_hat / XW, f32 accumulation)."""
    a = a_hat.astype(jnp.bfloat16)
    h = x
    n_layers = len(params["w"])
    for li in range(n_layers):
        xw = jnp.dot(h.astype(jnp.bfloat16), params["w"][li].astype(jnp.bfloat16),
                     preferred_element_type=jnp.float32).astype(jnp.bfloat16)
        h = jnp.dot(a, xw, preferred_element_type=jnp.float32) + params["b"][li]
        if li < n_layers - 1:
            mean = jnp.mean(h, axis=0, keepdims=True)
            var = jnp.mean((h - mean) ** 2, axis=0, keepdims=True)
            h = (h - mean) * jax.lax.rsqrt(var + BN_EPS)
            h = h * params["gamma"][li] + params["beta"][li]
            h = jnp.maximum(h, 0.0)   # Dropout is identity in eval mode
    return h


# ----------------------------------- main --------------------------------------
if __name__ == "__main__":
    key = jax.random.PRNGKey(0)
    k_x, k_e, k_p = jax.random.split(key, 3)

    num_nodes = 200          # padded to 256 -> a 2x2 A_hat tile grid per layer
    in_dim = 8
    num_edges = 600
    out_dim = 2

    x = jax.random.normal(k_x, (num_nodes, in_dim), jnp.float32)

    # Random undirected edge list (symmetrized), shape (2, E).
    src = jax.random.randint(k_e, (num_edges,), 0, num_nodes, jnp.int32)
    dst = jax.random.randint(jax.random.fold_in(k_e, 1), (num_edges,), 0,
                             num_nodes, jnp.int32)
    edge_index = jnp.stack([jnp.concatenate([src, dst]),
                            jnp.concatenate([dst, src])], axis=0)

    # Graph preprocessing done ONCE here (hoisted out of the forward pass).
    a_hat = normalized_adjacency(edge_index, num_nodes)
    a_pad, x_pad = pad_graph(a_hat, x)

    params = init_params(k_p, in_dim=in_dim, hid_dim=HID_DIM, out_dim=out_dim,
                         layers=NUM_LAYERS)
    w_stack, b_stack, g_stack, be_stack = pack_params(params)

    out = gcn_forward(a_pad, x_pad, w_stack, b_stack, g_stack, be_stack,
                      n_real=num_nodes, out_dim=out_dim)
    out = jax.block_until_ready(out)
    assert out.shape == (num_nodes, out_dim), out.shape

    ref = gcn_reference(a_hat, x, params)
    max_err = float(jnp.max(jnp.abs(out - ref)))
    assert max_err < 5e-2, f"max abs error vs reference: {max_err}"

    print("KERNEL_OK")
</pallas_src>

<mosaic_0001>
module attributes {stable_mosaic.version = 11 : i64} {
  func.func @gcn_fused_kernel(%arg0: i32, %arg1: i32, %arg2: i32, %arg3: memref<128x128xbf16, #tpu.memory_space<vmem>>, %arg4: memref<256x128xf32, #tpu.memory_space<vmem>>, %arg5: memref<1x128x128xf32, #tpu.memory_space<vmem>>, %arg6: memref<1x1x128xf32, #tpu.memory_space<vmem>>, %arg7: memref<1x1x128xf32, #tpu.memory_space<vmem>>, %arg8: memref<1x1x128xf32, #tpu.memory_space<vmem>>, %arg9: memref<256x128xf32, #tpu.memory_space<vmem>>, %arg10: memref<256x128xf32, #tpu.memory_space<vmem>>, %arg11: memref<256x128xbf16, #tpu.memory_space<vmem>>, %arg12: memref<128x128xf32, #tpu.memory_space<vmem>>) attributes {dimension_semantics = [#tpu.dimension_semantics<arbitrary>, #tpu.dimension_semantics<arbitrary>, #tpu.dimension_semantics<arbitrary>], iteration_bounds = array<i64: 3, 2, 2>, scalar_prefetch = 0 : i64, scratch_operands = 3 : i64, tpu.core_type = #tpu.core_type<tc>, window_params = [{transform_indices = @transform_0, window_bounds = array<i64: 128, 128>}, {pipeline_mode = #tpu.pipeline_mode<synchronous>, transform_indices = @transform_1, window_bounds = array<i64: 256, 128>}, {transform_indices = @transform_2, window_bounds = array<i64: 1, 128, 128>}, {transform_indices = @transform_3, window_bounds = array<i64: 1, 1, 128>}, {transform_indices = @transform_4, window_bounds = array<i64: 1, 1, 128>}, {transform_indices = @transform_5, window_bounds = array<i64: 1, 1, 128>}, {pipeline_mode = #tpu.pipeline_mode<synchronous>, transform_indices = @transform_6, window_bounds = array<i64: 256, 128>}]} {
    %c128_i32 = arith.constant 128 : i32
    %0 = arith.muli %arg1, %c128_i32 : i32
    %1 = tpu.assume_multiple %0, 128 : i32
    %c128_i32_0 = arith.constant 128 : i32
    %2 = arith.muli %arg2, %c128_i32_0 : i32
    %3 = tpu.assume_multiple %2, 128 : i32
    %c0_i32 = arith.constant 0 : i32
    %4 = arith.cmpi eq, %arg1, %c0_i32 : i32
    %c0_i32_1 = arith.constant 0 : i32
    %5 = arith.cmpi eq, %arg2, %c0_i32_1 : i32
    %6 = arith.andi %4, %5 : i1
    %7 = arith.extui %6 : i1 to i32
    %c0_i32_2 = arith.constant 0 : i32
    %8 = arith.cmpi ne, %7, %c0_i32_2 : i32
    scf.if %8 {
      %c0_i32_15 = arith.constant 0 : i32
      %27 = arith.cmpi eq, %arg0, %c0_i32_15 : i32
      %28 = arith.extui %27 : i1 to i32
      %c0_i32_16 = arith.constant 0 : i32
      %29 = arith.cmpi ne, %28, %c0_i32_16 : i32
      scf.if %29 {
        %c0_25 = arith.constant 0 : index
        %c0_26 = arith.constant 0 : index
        %38 = vector.load %arg4[%c0_25, %c0_26] : memref<256x128xf32, #tpu.memory_space<vmem>>, vector<256x128xf32>
        %c0_27 = arith.constant 0 : index
        %c0_28 = arith.constant 0 : index
        %39 = vector.load %arg10[%c0_27, %c0_28] : memref<256x128xf32, #tpu.memory_space<vmem>>, vector<256x128xf32>
        tpu.vector_store %arg10[%c0_27, %c0_28], %38 {strides = array<i32>} : memref<256x128xf32, #tpu.memory_space<vmem>>, vector<256x128xf32>,
      } else {
      }
      %c0_17 = arith.constant 0 : index
      %c0_18 = arith.constant 0 : index
      %30 = vector.load %arg10[%c0_17, %c0_18] : memref<256x128xf32, #tpu.memory_space<vmem>>, vector<256x128xf32>
      %31 = arith.truncf %30 : vector<256x128xf32> to vector<256x128xbf16>
      %c0_19 = arith.constant 0 : index
      %c0_20 = arith.constant 0 : index
      %c0_21 = arith.constant 0 : index
      %32 = vector.load %arg5[%c0_19, %c0_20, %c0_21] : memref<1x128x128xf32, #tpu.memory_space<vmem>>, vector<1x128x128xf32>
      %33 = vector.shape_cast %32 : vector<1x128x128xf32> to vector<128x128xf32>
      %34 = arith.truncf %33 : vector<128x128xf32> to vector<128x128xbf16>
      %cst_22 = arith.constant dense<0.000000e+00> : vector<256x128xf32>
      %35 = tpu.matmul %31, %34, %cst_22 {dimension_numbers = #tpu.dot_dimension_numbers<[1], [0], [0], [1], [0, 0, 1, 1], [], []>} : vector<256x128xbf16>, vector<128x128xbf16>, vector<256x128xf32> -> vector<256x128xf32>
      %36 = arith.truncf %35 : vector<256x128xf32> to vector<256x128xbf16>
      %c0_23 = arith.constant 0 : index
      %c0_24 = arith.constant 0 : index
      %37 = vector.load %arg11[%c0_23, %c0_24] : memref<256x128xbf16, #tpu.memory_space<vmem>>, vector<256x128xbf16>
      tpu.vector_store %arg11[%c0_23, %c0_24], %36 {strides = array<i32>} : memref<256x128xbf16, #tpu.memory_space<vmem>>, vector<256x128xbf16>,
    } else {
    }
    %c0_i32_3 = arith.constant 0 : i32
    %9 = arith.cmpi eq, %arg2, %c0_i32_3 : i32
    %10 = arith.extui %9 : i1 to i32
    %c0_i32_4 = arith.constant 0 : i32
    %11 = arith.cmpi ne, %10, %c0_i32_4 : i32
    scf.if %11 {
      %c0_15 = arith.constant 0 : index
      %c0_16 = arith.constant 0 : index
      %c0_17 = arith.constant 0 : index
      %27 = vector.load %arg6[%c0_15, %c0_16, %c0_17] : memref<1x1x128xf32, #tpu.memory_space<vmem>>, vector<1x1x128xf32>
      %28 = vector.shape_cast %27 : vector<1x1x128xf32> to vector<1x128xf32>
      %29 = vector.shape_cast %28 : vector<1x128xf32> to vector<1x128xf32>
      %30 = vector.broadcast %29 : vector<1x128xf32> to vector<128x128xf32>
      %c0_18 = arith.constant 0 : index
      %c0_19 = arith.constant 0 : index
      %31 = vector.load %arg12[%c0_18, %c0_19] : memref<128x128xf32, #tpu.memory_space<vmem>>, vector<128x128xf32>
      tpu.vector_store %arg12[%c0_18, %c0_19], %30 {strides = array<i32>} : memref<128x128xf32, #tpu.memory_space<vmem>>, vector<128x128xf32>,
    } else {
    }
    %c0 = arith.constant 0 : index
    %c0_5 = arith.constant 0 : index
    %12 = vector.load %arg12[%c0, %c0_5] : memref<128x128xf32, #tpu.memory_space<vmem>>, vector<128x128xf32>
    %c0_6 = arith.constant 0 : index
    %c0_7 = arith.constant 0 : index
    %13 = vector.load %arg3[%c0_6, %c0_7] : memref<128x128xbf16, #tpu.memory_space<vmem>>, vector<128x128xbf16>
    %14 = arith.index_cast %3 : i32 to index
    %c0_8 = arith.constant 0 : index
    %15 = vector.load %arg11[%14, %c0_8] : memref<256x128xbf16, #tpu.memory_space<vmem>>, vector<128x128xbf16>
    %cst = arith.constant dense<0.000000e+00> : vector<128x128xf32>
    %16 = tpu.matmul %13, %15, %cst {dimension_numbers = #tpu.dot_dimension_numbers<[1], [0], [0], [1], [0, 0, 1, 1], [], []>} : vector<128x128xbf16>, vector<128x128xbf16>, vector<128x128xf32> -> vector<128x128xf32>
    %17 = arith.addf %12, %16 : vector<128x128xf32>
    %c0_9 = arith.constant 0 : index
    %c0_10 = arith.constant 0 : index
    %18 = vector.load %arg12[%c0_9, %c0_10] : memref<128x128xf32, #tpu.memory_space<vmem>>, vector<128x128xf32>
    tpu.vector_store %arg12[%c0_9, %c0_10], %17 {strides = array<i32>} : memref<128x128xf32, #tpu.memory_space<vmem>>, vector<128x128xf32>,
    %c1_i32 = arith.constant 1 : i32
    %19 = arith.cmpi eq, %arg2, %c1_i32 : i32
    %20 = arith.extui %19 : i1 to i32
    %c0_i32_11 = arith.constant 0 : i32
    %21 = arith.cmpi ne, %20, %c0_i32_11 : i32
    scf.if %21 {
      %c0_15 = arith.constant 0 : index
      %c0_16 = arith.constant 0 : index
      %27 = vector.load %arg12[%c0_15, %c0_16] : memref<128x128xf32, #tpu.memory_space<vmem>>, vector<128x128xf32>
      %28 = arith.index_cast %1 : i32 to index
      %c0_17 = arith.constant 0 : index
      %29 = vector.load %arg10[%28, %c0_17] : memref<256x128xf32, #tpu.memory_space<vmem>>, vector<128x128xf32>
      tpu.vector_store %arg10[%28, %c0_17], %27 {strides = array<i32>} : memref<256x128xf32, #tpu.memory_space<vmem>>, vector<128x128xf32>,
    } else {
    }
    %c1_i32_12 = arith.constant 1 : i32
    %22 = arith.cmpi eq, %arg1, %c1_i32_12 : i32
    %c1_i32_13 = arith.constant 1 : i32
    %23 = arith.cmpi eq, %arg2, %c1_i32_13 : i32
    %24 = arith.andi %22, %23 : i1
    %25 = arith.extui %24 : i1 to i32
    %c0_i32_14 = arith.constant 0 : i32
    %26 = arith.cmpi ne, %25, %c0_i32_14 : i32
    scf.if %26 {
      %c2_i32 = arith.constant 2 : i32
      %27 = arith.cmpi slt, %arg0, %c2_i32 : i32
      %28 = arith.extui %27 : i1 to i32
      %c0_i32_15 = arith.constant 0 : i32
      %29 = arith.cmpi ne, %28, %c0_i32_15 : i32
      scf.if %29 {
        %c0_18 = arith.constant 0 : index
        %c0_19 = arith.constant 0 : index
        %33 = vector.load %arg10[%c0_18, %c0_19] : memref<256x128xf32, #tpu.memory_space<vmem>>, vector<256x128xf32>
        %34 = tpu.iota {dimensions = array<i32: 0>} : vector<256x1xi32>
        %c200_i32 = arith.constant 200 : i32
        %35 = vector.broadcast %c200_i32 : i32 to vector<256x1xi32>
        %36 = arith.cmpi slt, %34, %35 : vector<256x1xi32>
        %37 = arith.extui %36 : vector<256x1xi1> to vector<256x1xi32>
        %38 = arith.sitofp %37 : vector<256x1xi32> to vector<256x1xf32>
        %39 = vector.broadcast %38 : vector<256x1xf32> to vector<256x128xf32>
        %40 = arith.mulf %33, %39 : vector<256x128xf32>
        %cst_20 = arith.constant dense<0.000000e+00> : vector<128xf32>
        %41 = vector.multi_reduction <add>, %40, %cst_20 [0] : vector<256x128xf32> to vector<128xf32>
        %42 = vector.shape_cast %41 : vector<128xf32> to vector<1x128xf32>
        %cst_21 = arith.constant 5.000000e-03 : f32
        %43 = vector.broadcast %cst_21 : f32 to vector<1x128xf32>
        %44 = arith.mulf %42, %43 : vector<1x128xf32>
        %45 = vector.broadcast %44 : vector<1x128xf32> to vector<256x128xf32>
        %46 = arith.subf %33, %45 : vector<256x128xf32>
        %47 = arith.mulf %46, %46 : vector<256x128xf32>
        %48 = vector.broadcast %38 : vector<256x1xf32> to vector<256x128xf32>
        %49 = arith.mulf %47, %48 : vector<256x128xf32>
        %cst_22 = arith.constant dense<0.000000e+00> : vector<128xf32>
        %50 = vector.multi_reduction <add>, %49, %cst_22 [0] : vector<256x128xf32> to vector<128xf32>
        %51 = vector.shape_cast %50 : vector<128xf32> to vector<1x128xf32>
        %cst_23 = arith.constant 5.000000e-03 : f32
        %52 = vector.broadcast %cst_23 : f32 to vector<1x128xf32>
        %53 = arith.mulf %51, %52 : vector<1x128xf32>
        %cst_24 = arith.constant 9.99999974E-6 : f32
        %54 = vector.broadcast %cst_24 : f32 to vector<1x128xf32>
        %55 = arith.addf %53, %54 : vector<1x128xf32>
        %56 = math.rsqrt %55 : vector<1x128xf32>
        %57 = vector.broadcast %56 : vector<1x128xf32> to vector<256x128xf32>
        %58 = arith.mulf %46, %57 : vector<256x128xf32>
        %c0_25 = arith.constant 0 : index
        %c0_26 = arith.constant 0 : index
        %c0_27 = arith.constant 0 : index
        %59 = vector.load %arg7[%c0_25, %c0_26, %c0_27] : memref<1x1x128xf32, #tpu.memory_space<vmem>>, vector<1x1x128xf32>
        %60 = vector.shape_cast %59 : vector<1x1x128xf32> to vector<1x128xf32>
        %61 = vector.broadcast %60 : vector<1x128xf32> to vector<256x128xf32>
        %62 = arith.mulf %58, %61 : vector<256x128xf32>
        %c0_28 = arith.constant 0 : index
        %c0_29 = arith.constant 0 : index
        %c0_30 = arith.constant 0 : index
        %63 = vector.load %arg8[%c0_28, %c0_29, %c0_30] : memref<1x1x128xf32, #tpu.memory_space<vmem>>, vector<1x1x128xf32>
        %64 = vector.shape_cast %63 : vector<1x1x128xf32> to vector<1x128xf32>
        %65 = vector.broadcast %64 : vector<1x128xf32> to vector<256x128xf32>
        %66 = arith.addf %62, %65 : vector<256x128xf32>
        %cst_31 = arith.constant 0.000000e+00 : f32
        %67 = vector.broadcast %cst_31 : f32 to vector<256x128xf32>
        %68 = arith.maximumf %66, %67 : vector<256x128xf32>
        %69 = vector.broadcast %38 : vector<256x1xf32> to vector<256x128xf32>
        %70 = arith.mulf %68, %69 : vector<256x128xf32>
        %c0_32 = arith.constant 0 : index
        %c0_33 = arith.constant 0 : index
        %71 = vector.load %arg10[%c0_32, %c0_33] : memref<256x128xf32, #tpu.memory_space<vmem>>, vector<256x128xf32>
        tpu.vector_store %arg10[%c0_32, %c0_33], %70 {strides = array<i32>} : memref<256x128xf32, #tpu.memory_space<vmem>>, vector<256x128xf32>,
      } else {
      }
      %c2_i32_16 = arith.constant 2 : i32
      %30 = arith.cmpi eq, %arg0, %c2_i32_16 : i32
      %31 = arith.extui %30 : i1 to i32
      %c0_i32_17 = arith.constant 0 : i32
      %32 = arith.cmpi ne, %31, %c0_i32_17 : i32
      scf.if %32 {
        %c0_18 = arith.constant 0 : index
        %c0_19 = arith.constant 0 : index
        %33 = vector.load %arg10[%c0_18, %c0_19] : memref<256x128xf32, #tpu.memory_space<vmem>>, vector<256x128xf32>
        %c0_20 = arith.constant 0 : index
        %c0_21 = arith.constant 0 : index
        %34 = vector.load %arg9[%c0_20, %c0_21] : memref<256x128xf32, #tpu.memory_space<vmem>>, vector<256x128xf32>
        tpu.vector_store %arg9[%c0_20, %c0_21], %33 {strides = array<i32>} : memref<256x128xf32, #tpu.memory_space<vmem>>, vector<256x128xf32>,
      } else {
      }
    } else {
    }
    return
  }
  func.func @transform_0(%arg0: i32, %arg1: i32, %arg2: i32) -> (i32, i32) {
    %c0_i32 = arith.constant 0 : i32
    return %arg1, %arg2 : i32, i32
  }
  func.func @transform_1(%arg0: i32, %arg1: i32, %arg2: i32) -> (i32, i32) {
    %c0_i32 = arith.constant 0 : i32
    %c0_i32_0 = arith.constant 0 : i32
    %c0_i32_1 = arith.constant 0 : i32
    return %c0_i32, %c0_i32_0 : i32, i32
  }
  func.func @transform_2(%arg0: i32, %arg1: i32, %arg2: i32) -> (i32, i32, i32) {
    %c0_i32 = arith.constant 0 : i32
    %c0_i32_0 = arith.constant 0 : i32
    %c0_i32_1 = arith.constant 0 : i32
    return %arg0, %c0_i32, %c0_i32_0 : i32, i32, i32
  }
  func.func @transform_3(%arg0: i32, %arg1: i32, %arg2: i32) -> (i32, i32, i32) {
    %c0_i32 = arith.constant 0 : i32
    %c0_i32_0 = arith.constant 0 : i32
    %c0_i32_1 = arith.constant 0 : i32
    return %arg0, %c0_i32, %c0_i32_0 : i32, i32, i32
  }
  func.func @transform_4(%arg0: i32, %arg1: i32, %arg2: i32) -> (i32, i32, i32) {
    %c0_i32 = arith.constant 0 : i32
    %c0_i32_0 = arith.constant 0 : i32
    %c0_i32_1 = arith.constant 0 : i32
    return %arg0, %c0_i32, %c0_i32_0 : i32, i32, i32
  }
  func.func @transform_5(%arg0: i32, %arg1: i32, %arg2: i32) -> (i32, i32, i32) {
    %c0_i32 = arith.constant 0 : i32
    %c0_i32_0 = arith.constant 0 : i32
    %c0_i32_1 = arith.constant 0 : i32
    return %arg0, %c0_i32, %c0_i32_0 : i32, i32, i32
  }
  func.func @transform_6(%arg0: i32, %arg1: i32, %arg2: i32) -> (i32, i32) {
    %c0_i32 = arith.constant 0 : i32
    %c0_i32_0 = arith.constant 0 : i32
    %c0_i32_1 = arith.constant 0 : i32
    return %c0_i32, %c0_i32_0 : i32, i32
  }
}

</mosaic_0001>

<bundles_post_ra>
// kernel: gcn_forward.1
= control target key start
LH: loop header
LB: loop body
LE: loop exit
PB: predicated region body
PF: predicated region fallthrough
CT: control target
= control target key end

     0   :  { %s3361_s0 = inlined_call_operand.hbm [shape: bf16[256,256], index: 0, kind: input, shape index: {}]   ;;  %s3362_s1 = inlined_call_operand.hbm [shape: f32[256,128], index: 1, kind: input, shape index: {}]   ;;  %s3363_s2 = inlined_call_operand.hbm [shape: f32[3,128,128], index: 2, kind: input, shape index: {}]   ;;  %s3364_s3 = inlined_call_operand.hbm [shape: f32[3,1,128], index: 3, kind: input, shape index: {}]   ;;  %s3365_s4 = inlined_call_operand.vmem [shape: f32[3,1,128], index: 4, kind: input, shape index: {}]   ;;  %s3366_s5 = inlined_call_operand.hbm [shape: f32[3,1,128], index: 5, kind: input, shape index: {}]   ;;  %s3367_s6 = inlined_call_operand.vmem [shape: f32[256,128], index: 6, kind: output, shape index: {}]  }
   0x1   :  { %3380 = sst [smem:[#allocation23_spill]] %s3361_s0 }
   0x2   :  { %3381 = sst [smem:[#allocation24_spill]] %s3363_s2 }
   0x3   :  { %3382 = sst [smem:[#allocation25_spill]] %s3364_s3 }
   0x4   :  { %3383 = sst [smem:[#allocation26_spill]] %s3365_s4 }
   0x5   :  { %3384 = sst [smem:[#allocation27_spill]] %s3367_s6 }
   0x6   :  { %11 = vsyncpa [#allocation6], 0 }
   0x7   :  { %13 = vsyncpa [#allocation6 + $0x1], 0 }
   0x8   :  { %14 = vsyncpa [#allocation8], 0  ;;  %s2496_s21 = smov 0   ;;  %s2498_s22 = smov 0  }
   0x9   :  { %s2500_s23 = smov 0   ;;  %s2502_s24 = smov 0  }
   0xa   :  { %s2504_s25 = smov 0   ;;  %s2506_s26 = smov 0  }
   0xb   :  { %s2508_s27 = smov 0   ;;  %s2510_s28 = smov 0  }
   0xc   :  { %s2512_s29 = smov 0   ;;  %s2514_s30 = smov 0  }
   0xd   :  { %s2516_s7 = smov 0   ;;  %s2518_s8 = smov 0  }
   0xe   :  { %s2520_s9 = smov 0  }
   0xf LB: > { %3385 = sst [smem:[#allocation15_spill]] %s2430_s27  ;;  %s32_s10 = sadd.s32 1, %s2442_s30  ;;  %s2454_s9 = sphi %s2520_s9, %s20_s9   ;;  %s2450_s8 = sphi %s2518_s8, %s3432_s8   ;;  %s2446_s7 = sphi %s2516_s7, %s3422_s7   ;;  %s2442_s30 = sphi %s2514_s30, %s3421_s30   ;;  %s2438_s29 = sphi %s2512_s29, %s3431_s29   ;;  %s2434_s28 = sphi %s2510_s28, %s3420_s28   ;;  %s2430_s27 = sphi %s2508_s27, %s3419_s27   ;;  %s2426_s26 = sphi %s2506_s26, %s3430_s26   ;;  %s2422_s25 = sphi %s2504_s25, %s3429_s25   ;;  %s2418_s24 = sphi %s2502_s24, %s3428_s24   ;;  %s2414_s23 = sphi %s2500_s23, %s3427_s23   ;;  %s2410_s22 = sphi %s2498_s22, %s3426_s22   ;;  %s2406_s21 = sphi %s2496_s21, %s3425_s21  }
  0x10   : > { %3386 = sst [smem:[#allocation16_spill]] %s2434_s28  ;;  %s35_s11 = sadd.s32 1, %s2446_s7 }
  0x11   : > { %3387 = sst [smem:[#allocation17_spill]] %s2438_s29  ;;  %p33_p0 = scmp.ge.s32.totalorder %s32_s10, 2 }
  0x12   : > { %3388 = sst [smem:[#allocation18_spill]] %s2442_s30  ;;  %s48_s12 = sadd.s32 1, %s2426_s26 }
  0x13   : > { %3389 = sst [smem:[#allocation19_spill]] %s2446_s7  ;;  %p55_p1 = scmp.ne.s32.totalorder %s2426_s26, %s2422_s25 }
  0x14   : > { %p56_p2 = scmp.eq.s32.totalorder %s2454_s9, 0  ;;  %s3434_s10 = smov (%p33_p0, %s32_s10), 0 }
  0x15   : > { %3390 = sst [smem:[#allocation20_spill]] %s3434_s10  ;;  %s3436_s11 = smov (!%p33_p0, %s35_s11), %s2446_s7 }
  0x16   : > { %s44_s13 = ssub.s32 %s2442_s30, %s3434_s10  ;;  %p2576_p3 = por %p56_p2, %p55_p1 }
  0x17   : > { %p37_p4 = scmp.ge.s32.totalorder %s3436_s11, 2  ;;  %p61_p5 = scmp.ne.s32.totalorder %s2422_s25, %s2418_s24 }
  0x18   : > { %p2074_p6 = scmp.lt.s32.totalorder %s2454_s9, 12  ;;  %s245_s16 = sand.u32 1, %s2454_s9  }
  0x19   : > { %s2586_s15 = scalar_select %p37_p4, 0, %s3436_s11  }
  0x1a   : > { %s247_s19 = sand.u32 1, %s2426_s26   ;;  %s1883_s10 = sshll.u32 %s2446_s7, 5 }
  0x1b   : > { %3392 = sst [smem:[#allocation21_spill]] %s2586_s15  ;;  %s43_s17 = ssub.s32 %s2446_s7, %s2586_s15 }
  0x1c   : > { %s45_s18 = sor.u32 %s44_s13, %s43_s17  ;;  %s1798_s20 = sshll.u32 %s247_s19, 6 }
  0x1d   : > { %p46_p7 = scmp.eq.s32.totalorder %s45_s18, 0  ;;  %s254_s4 = sadd.s32 %s2442_s30, %s1883_s10 }
  0x1e   : > { %s249_s27 = scalar_lea.vmem [#allocation5], %s1798_s20  ;;  %s1801_s29 = sshll.u32 %s254_s4, 2 }
  0x1f   : > { %s2595_s6 = scalar_select %p46_p7, %s2426_s26, %s48_s12  }
  0x20   : > { %s259_s28 = sshll.u32 %s249_s27, 4  ;;  %s3393_s0 = sld [smem:[#allocation23_spill]]  ;;  %s260_s28 = int_to_ptr.vmem [resolvable:$true] %s259_s28 }
  0x21   : > { %p2061_p8 = pnand %p2074_p6, %p2576_p3  ;;  %s2605_s10 = scalar_lea.sflag [#allocation6], %s245_s16 }
  0x22   : > { %s3375_s18 = smov 128   ;;  %s2457_s27 = smov 64  }
  0x23   : > { %s2458_s4 = smov 4   ;;  %s39_s19 = sadd.s32 1, %s2450_s8 }
  0x24   : > { %s3438_s19 = smov (!%p37_p4, %s39_s19), %s2450_s8  ;;  %p102_p9 = scmp.ne.s32.totalorder %s2414_s23, %s2410_s22 }
  0x25   : > { %p41_p10 = scmp.ge.s32.totalorder %s3438_s19, 3  ;;  %s2623_s15 = sand.u32 1, %s2414_s23  }
  0x26   : > { %s256_s17 = scalar_lea.hbm %s3393_s0, %s1801_s29  ;;  %s95_s29 = sadd.s32 1, %s2414_s23 }
  0x27   : > { %s257_s12 = sshll.u32 %s256_s17, 4  ;;  %p2618_p11 = por %p102_p9, %p56_p2  ;;  %s258_s12 = int_to_ptr.hbm [resolvable:$true] %s257_s12 }
  0x28   : > { %2063 = dma.hbm_to_vmem [thread:$0]  (!%p2061_p8), %s258_s12, 1024, %s260_s28, %s2605_s10, %s3375_s18, %s2457_s27, %s2458_s4  }
  0x29   : > { %s3440_s19 = smov (%p41_p10, %s3438_s19), 0  ;;  %s1802_s28 = sshll.u32 %s2623_s15, 7 }
  0x2a   : > { %3395 = sst [smem:[#allocation22_spill]] %s3440_s19  ;;  %s1884_s11 = sshll.u32 %s2450_s8, 7 }
  0x2b   : > { %s92_s16 = ssub.s32 %s2450_s8, %s3440_s19  ;;  %s3396_s2 = sld [smem:[#allocation24_spill]] }
  0x2c   : > { %p93_p12 = scmp.eq.s32.totalorder %s92_s16, 0  ;;  %s273_s27 = scalar_lea.vmem [#allocation9], %s1802_s28 }
  0x2d   : > { %s281_s4 = sshll.u32 %s273_s27, 4  ;;  %p2641_p13 = pnand %p2074_p6, %p2618_p11  ;;  %s282_s4 = int_to_ptr.vmem [resolvable:$true] %s281_s4 }
  0x2e   : > { %s2635_s18 = scalar_select %p93_p12, %s2414_s23, %s95_s29  }
  0x2f   : > { %s3398_s3 = sld [smem:[#allocation25_spill]]  ;;  %s294_s29 = scalar_lea.vmem [#allocation10], %s2623_s15 }
  0x30   : > { %s301_s13 = sshll.u32 %s294_s29, 4  ;;  %s2459_s27 = smov 8   ;;  %s302_s13 = int_to_ptr.vmem [resolvable:$true] %s301_s13 }
  0x31   : > { %s278_s17 = scalar_lea.hbm %s3396_s2, %s1884_s11  ;;  %s3399_s0 = smov 128  }
  0x32   : > { %s279_s12 = sshll.u32 %s278_s17, 4  ;;  %s1794_s14 = sadd.s32 4294967295, %s2454_s9   ;;  %s280_s12 = int_to_ptr.hbm [resolvable:$true] %s279_s12 }
  0x33   : > { %2066 = dma.hbm_to_vmem [thread:$0]  (!%p2641_p13), %s280_s12, 2048, %s282_s4, %s2605_s10, %s3399_s0, %s3399_s0, %s2459_s27  }
  0x34   : > { %p108_p0 = scmp.ne.s32.totalorder %s2410_s22, %s2406_s21  ;;  %p2661_p1 = scmp.eq.s32.totalorder %s1794_s14, 0 }
  0x35   : > { %s297_s28 = scalar_lea.hbm %s3398_s3, %s2450_s8  ;;  %p1795_p2 = scmp.ge.s32.totalorder %s2454_s9, 1 }
  0x36   : > { %s299_s17 = sshll.u32 %s297_s28, 4  ;;  %p218_p3 = scmp.lt.s32.totalorder %s2454_s9, 13  ;;  %s300_s17 = int_to_ptr.hbm [resolvable:$true] %s299_s17 }
  0x37   : > { %2069 = dma.hbm_to_vmem [thread:$0]  (!%p2641_p13), %s300_s17, 16, %s302_s13, %s2605_s10  }
  0x38   : > { %p2672_p4 = por %p2661_p1, %p61_p5  ;;  %p2678_p6 = por %p108_p0, %p2661_p1 }
  0x39   : > { %p2682_p7 = pnand %p1795_p2, %p218_p3  ;;  %s229_s24 = sshll.u32 %s3362_s1, 4  ;;  %s230_s24 = int_to_ptr.hbm [resolvable:$true] %s229_s24 }
  0x3a   : > { %s2460_s29 = smov [#allocation7]   ;;  %s320_s3 = scalar_lea.hbm %s3366_s5, %s2450_s8 }
  0x3b   : > { %p2056_p5 = pneg %p2682_p7  ;;  %s231_s13 = sshll.u32 %s2460_s29, 4  ;;  %s232_s13 = int_to_ptr.vmem [resolvable:$true] %s231_s13 }
  0x3c   : > { %s322_s19 = sshll.u32 %s320_s3, 4  ;;  %s317_s7 = scalar_lea.vmem [#allocation11], %s2623_s15  ;;  %s323_s19 = int_to_ptr.hbm [resolvable:$true] %s322_s19 }
  0x3d   : > { %p2057_p8 = pnand %p2056_p5, %p2661_p1  ;;  %s324_s30 = sshll.u32 %s317_s7, 4  ;;  %s325_s30 = int_to_ptr.vmem [resolvable:$true] %s324_s30 }
  0x3e   : > { %2072 = dma.hbm_to_vmem [thread:$0]  (!%p2641_p13), %s323_s19, 16, %s325_s30, %s2605_s10  }
  0x3f   : > { %2059 = dma.hbm_to_vmem [thread:$0]  (!%p2057_p8), %s230_s24, 4096, %s232_s13, [#allocation8], %s3399_s0, %s3399_s0, %s2459_s27  }
  0x40   : > { %333 = sbr.rel (%p2682_p7) target bundleno = 890 (0x37a), region = 44  ;;  %s335_s20 = sand.u32 (!%p2682_p7), 1, %s1794_s14  }
  0x41   : > { %s337_s28 = sand.u32 (!%p2682_p7), 1, %s2422_s25   ;;  %s336_s2 = scalar_lea.sflag (!%p2682_p7), [#allocation6], %s335_s20 }
  0x42   : > { %s1806_s29 = sshll.u32 (!%p2682_p7), %s337_s28, 6 }
  0x43   : > { %s2706_s17 = scalar_lea.vmem (!%p2682_p7), [#allocation5], %s1806_s29 }
  0x45   : > { %2393 = dma.done.wait (%p2672_p4), %s336_s2, 1024  }
  0x46   : > { %2395 = vsyncadd (%p2672_p4), %s336_s2, 4294966272 }
  0x47   : > { %2397 = dma.done.wait (%p2661_p1), [#allocation8], 4096  }
  0x48   : > { %2399 = vsyncadd (%p2661_p1), [#allocation8], 4294963200  ;;  %s2717_s0 = sand.u32 1, %s2410_s22  }
  0x49   : > { %s1808_s3 = sshll.u32 %s2717_s0, 7 }
  0x4a   : > { %s2720_s30 = scalar_lea.vmem [#allocation9], %s1808_s3 }
  0x4b   : > { %2401 = dma.done.wait (%p2678_p6), %s336_s2, 2080  }
  0x4c   : > { %2403 = vsyncadd (%p2678_p6), %s336_s2, 4294965216  ;;  %s3404_s7 = sld [smem:[#allocation17_spill]]  ;;  %s363_s4 = scalar_lea.vmem [#allocation10], %s2717_s0 }
  0x4d   : > { %s3405_s10 = sld [smem:[#allocation16_spill]]  ;;  %s372_s21 = scalar_lea.vmem [#allocation11], %s2717_s0 }
  0x4e   : > { %s3406_s19 = sld [smem:[#allocation15_spill]] }
  0x4f   : > { %s3407_s11 = sld [smem:[#allocation26_spill]] }
  0x52   : > { %p414_p9 = scmp.lt.s32.totalorder %s3404_s7, 2 }
  0x53   : > { %s1809_s15 = sshll.u32 %s3405_s10, 7  ;;  %p419_p10 = scmp.eq.s32.totalorder %s3405_s10, 0 }
  0x54   : > { %s1810_s16 = sshll.u32 %s3406_s19, 7  ;;  %s3442_s7 = smov (!%p414_p9, %s3404_s7), 2 }
  0x55   : > { %p420_p11 = scmp.eq.s32.totalorder %s3406_s19, 0  ;;  %s416_s12 = scalar_lea.vmem %s3407_s11, %s3442_s7 }
  0x57   : > { %p421_p12 = pnand %p420_p11, %p419_p10 }
  0x58   : > { %s3408_s24 = sld [smem:[#allocation17_spill]] (!%p421_p12) }
  0x59   : > { %424 = sbr.rel (%p421_p12) target bundleno = 361 (0x169), region = 68 }
  0x5e   : > { %p1811_p13 = scmp.ne.s32.totalorder %s3408_s24, 0 }
  0x60   : > { %428 = sbr.rel (%p1811_p13) target bundleno = 134 (0x86), region = 72 }
  0x65   : > { %v429_v0 = vld [vmem:[#allocation7] sm:$0xff]  ;;  %v430_v1 = vld [vmem:[#allocation7 + $0x8] sm:$0xff]  ;;  %v431_v2 = vld [vmem:[#allocation7 + $0x10] sm:$0xff] }
  0x66   : > { %461 = vst [vmem:[#allocation2] sm:$0xff] %v429_v0  ;;  %v432_v3 = vld [vmem:[#allocation7 + $0x18] sm:$0xff]  ;;  %v433_v4 = vld [vmem:[#allocation7 + $0x20] sm:$0xff]  ;;  %v434_v5 = vld [vmem:[#allocation7 + $0x28] sm:$0xff] }
  0x67   : > { %462 = vst [vmem:[#allocation2 + $0x8] sm:$0xff] %v430_v1  ;;  %v435_v6 = vld [vmem:[#allocation7 + $0x30] sm:$0xff]  ;;  %v436_v7 = vld [vmem:[#allocation7 + $0x38] sm:$0xff]  ;;  %v437_v8 = vld [vmem:[#allocation7 + $0x40] sm:$0xff] }
  0x68   : > { %463 = vst [vmem:[#allocation2 + $0x10] sm:$0xff] %v431_v2  ;;  %v438_v9 = vld [vmem:[#allocation7 + $0x48] sm:$0xff]  ;;  %v439_v10 = vld [vmem:[#allocation7 + $0x50] sm:$0xff]  ;;  %v440_v11 = vld [vmem:[#allocation7 + $0x58] sm:$0xff] }
  0x69   : > { %464 = vst [vmem:[#allocation2 + $0x18] sm:$0xff] %v432_v3  ;;  %v441_v12 = vld [vmem:[#allocation7 + $0x60] sm:$0xff]  ;;  %v442_v13 = vld [vmem:[#allocation7 + $0x68] sm:$0xff]  ;;  %v443_v14 = vld [vmem:[#allocation7 + $0x70] sm:$0xff] }
  0x6a   : > { %465 = vst [vmem:[#allocation2 + $0x20] sm:$0xff] %v433_v4  ;;  %v444_v15 = vld [vmem:[#allocation7 + $0x78] sm:$0xff]  ;;  %v445_v16 = vld [vmem:[#allocation7 + $0x80] sm:$0xff]  ;;  %v446_v17 = vld [vmem:[#allocation7 + $0x88] sm:$0xff] }
  0x6b   : > { %466 = vst [vmem:[#allocation2 + $0x28] sm:$0xff] %v434_v5  ;;  %v447_v18 = vld [vmem:[#allocation7 + $0x90] sm:$0xff]  ;;  %v448_v19 = vld [vmem:[#allocation7 + $0x98] sm:$0xff]  ;;  %v449_v20 = vld [vmem:[#allocation7 + $0xa0] sm:$0xff] }
  0x6c   : > { %467 = vst [vmem:[#allocation2 + $0x30] sm:$0xff] %v435_v6  ;;  %v450_v21 = vld [vmem:[#allocation7 + $0xa8] sm:$0xff]  ;;  %v451_v22 = vld [vmem:[#allocation7 + $0xb0] sm:$0xff]  ;;  %v452_v23 = vld [vmem:[#allocation7 + $0xb8] sm:$0xff] }
  0x6d   : > { %468 = vst [vmem:[#allocation2 + $0x38] sm:$0xff] %v436_v7  ;;  %v453_v24 = vld [vmem:[#allocation7 + $0xc0] sm:$0xff]  ;;  %v454_v25 = vld [vmem:[#allocation7 + $0xc8] sm:$0xff]  ;;  %v455_v26 = vld [vmem:[#allocation7 + $0xd0] sm:$0xff] }
  0x6e   : > { %469 = vst [vmem:[#allocation2 + $0x40] sm:$0xff] %v437_v8  ;;  %v456_v27 = vld [vmem:[#allocation7 + $0xd8] sm:$0xff]  ;;  %v457_v28 = vld [vmem:[#allocation7 + $0xe0] sm:$0xff]  ;;  %v458_v29 = vld [vmem:[#allocation7 + $0xe8] sm:$0xff] }
  0x6f   : > { %470 = vst [vmem:[#allocation2 + $0x48] sm:$0xff] %v438_v9  ;;  %v459_v30 = vld [vmem:[#allocation7 + $0xf0] sm:$0xff]  ;;  %v460_v31 = vld [vmem:[#allocation7 + $0xf8] sm:$0xff] }
  0x70   : > { %471 = vst [vmem:[#allocation2 + $0x50] sm:$0xff] %v439_v10 }
  0x71   : > { %472 = vst [vmem:[#allocation2 + $0x58] sm:$0xff] %v440_v11 }
  0x72   : > { %473 = vst [vmem:[#allocation2 + $0x60] sm:$0xff] %v441_v12 }
  0x73   : > { %474 = vst [vmem:[#allocation2 + $0x68] sm:$0xff] %v442_v13 }
  0x74   : > { %475 = vst [vmem:[#allocation2 + $0x70] sm:$0xff] %v443_v14 }
  0x75   : > { %476 = vst [vmem:[#allocation2 + $0x78] sm:$0xff] %v444_v15 }
  0x76   : > { %477 = vst [vmem:[#allocation2 + $0x80] sm:$0xff] %v445_v16 }
  0x77   : > { %478 = vst [vmem:[#allocation2 + $0x88] sm:$0xff] %v446_v17 }
  0x78   : > { %479 = vst [vmem:[#allocation2 + $0x90] sm:$0xff] %v447_v18 }
  0x79   : > { %480 = vst [vmem:[#allocation2 + $0x98] sm:$0xff] %v448_v19 }
  0x7a   : > { %481 = vst [vmem:[#allocation2 + $0xa0] sm:$0xff] %v449_v20 }
  0x7b   : > { %482 = vst [vmem:[#allocation2 + $0xa8] sm:$0xff] %v450_v21 }
  0x7c   : > { %483 = vst [vmem:[#allocation2 + $0xb0] sm:$0xff] %v451_v22 }
  0x7d   : > { %484 = vst [vmem:[#allocation2 + $0xb8] sm:$0xff] %v452_v23 }
  0x7e   : > { %485 = vst [vmem:[#allocation2 + $0xc0] sm:$0xff] %v453_v24 }
  0x7f   : > { %486 = vst [vmem:[#allocation2 + $0xc8] sm:$0xff] %v454_v25 }
  0x80   : > { %487 = vst [vmem:[#allocation2 + $0xd0] sm:$0xff] %v455_v26 }
  0x81   : > { %488 = vst [vmem:[#allocation2 + $0xd8] sm:$0xff] %v456_v27 }
  0x82   : > { %489 = vst [vmem:[#allocation2 + $0xe0] sm:$0xff] %v457_v28 }
  0x83   : > { %490 = vst [vmem:[#allocation2 + $0xe8] sm:$0xff] %v458_v29 }
  0x84   : > { %491 = vst [vmem:[#allocation2 + $0xf0] sm:$0xff] %v459_v30 }
  0x85   : > { %492 = vst [vmem:[#allocation2 + $0xf8] sm:$0xff] %v460_v31 }
  0x86 PF: > { %v555_v32 = vld [vmem:[%s2720_s30 + $0x70] sm:$0xff]  ;;  %v556_v33 = vld [vmem:[%s2720_s30 + $0x78] sm:$0xff]  ;;  %v553_v34 = vld [vmem:[%s2720_s30 + $0x60] sm:$0xff] }
  0x87   : > { %v564_v35 = vpack.c.bf16 %v556_v33, %v555_v32  ;;  %v554_v36 = vld [vmem:[%s2720_s30 + $0x68] sm:$0xff]  ;;  %v551_v38 = vld [vmem:[%s2720_s30 + $0x50] sm:$0xff]  ;;  %v552_v39 = vld [vmem:[%s2720_s30 + $0x58] sm:$0xff] }
  0x88   : > { %v563_v37 = vpack.c.bf16 %v554_v36, %v553_v34  ;;  %v562_v40 = vpack.c.bf16 %v552_v39, %v551_v38  ;;  %v549_v41 = vld [vmem:[%s2720_s30 + $0x40] sm:$0xff]  ;;  %v550_v42 = vld [vmem:[%s2720_s30 + $0x48] sm:$0xff]  ;;  %v547_v44 = vld [vmem:[%s2720_s30 + $0x30] sm:$0xff] }
  0x89   : > { %565 = vmatpush.bf16.msra.mxu0 %v564_v35  ;;  %1996 = vmatpush.bf16.msra.mxu1 %v564_v35  ;;  %v561_v43 = vpack.c.bf16 %v550_v42, %v549_v41  ;;  %v548_v45 = vld [vmem:[%s2720_s30 + $0x38] sm:$0xff]  ;;  %v545_v47 = vld [vmem:[%s2720_s30 + $0x20] sm:$0xff]  ;;  %v546_v48 = vld [vmem:[%s2720_s30 + $0x28] sm:$0xff] }
  0x8a   : > { %1997 = vmatpush.bf16.msra.mxu2 %v564_v35  ;;  %1998 = vmatpush.bf16.msra.mxu3 %v564_v35  ;;  %v560_v46 = vpack.c.bf16 %v548_v45, %v547_v44  ;;  %v559_v49 = vpack.c.bf16 %v546_v48, %v545_v47  ;;  %v543_v50 = vld [vmem:[%s2720_s30 + $0x10] sm:$0xff]  ;;  %v544_v51 = vld [vmem:[%s2720_s30 + $0x18] sm:$0xff]  ;;  %v541_v53 = vld [vmem:[%s2720_s30] sm:$0xff] }
  0x8b   : > { %v558_v52 = vpack.c.bf16 %v544_v51, %v543_v50  ;;  %v542_v54 = vld [vmem:[%s2720_s30 + $0x8] sm:$0xff]  ;;  %v493_v55 = vld [vmem:[#allocation2] sm:$0xff]  ;;  %v495_v4 = vld [vmem:[#allocation2 + $0x10] sm:$0xff] }
  0x8c   : > { %v494_v56 = vld [vmem:[#allocation2 + $0x8] sm:$0xff]  ;;  %v557_v57 = vpack.c.bf16 %v542_v54, %v541_v53  ;;  %v501_v58 = vld [vmem:[#allocation2 + $0x40] sm:$0xff]  ;;  %v496_v5 = vld [vmem:[#allocation2 + $0x18] sm:$0xff] }
  0x8d   : > { %566 = vmatpush.bf16.msra.mxu0 %v563_v37  ;;  %1999 = vmatpush.bf16.msra.mxu1 %v563_v37  ;;  %v502_v59 = vld [vmem:[#allocation2 + $0x48] sm:$0xff]  ;;  %v509_v60 = vld [vmem:[#allocation2 + $0x80] sm:$0xff]  ;;  %v525_v0 = vpack.c.bf16 %v494_v56, %v493_v55  ;;  %v503_v6 = vld [vmem:[#allocation2 + $0x50] sm:$0xff]  ;;  %v526_v12 = vpack.c.bf16 %v496_v5, %v495_v4 }
  0x8e   : > { %2000 = vmatpush.bf16.msra.mxu2 %v563_v37  ;;  %2001 = vmatpush.bf16.msra.mxu3 %v563_v37  ;;  %v510_v61 = vld [vmem:[#allocation2 + $0x88] sm:$0xff]  ;;  %v517_v62 = vld [vmem:[#allocation2 + $0xc0] sm:$0xff]  ;;  %v529_v1 = vpack.c.bf16 %v502_v59, %v501_v58  ;;  %v504_v7 = vld [vmem:[#allocation2 + $0x58] sm:$0xff] }
  0x8f   : > { %v518_v63 = vld [vmem:[#allocation2 + $0xc8] sm:$0xff]  ;;  %v533_v2 = vpack.c.bf16 %v510_v61, %v509_v60  ;;  %v511_v8 = vld [vmem:[#allocation2 + $0x90] sm:$0xff]  ;;  %v512_v9 = vld [vmem:[#allocation2 + $0x98] sm:$0xff]  ;;  %v530_v13 = vpack.c.bf16 %v504_v7, %v503_v6 }
  0x90   : > { %v537_v3 = vpack.c.bf16 %v518_v63, %v517_v62  ;;  %v519_v10 = vld [vmem:[#allocation2 + $0xd0] sm:$0xff]  ;;  %v520_v11 = vld [vmem:[#allocation2 + $0xd8] sm:$0xff]  ;;  %v534_v14 = vpack.c.bf16 %v512_v9, %v511_v8  ;;  %v497_v16 = vld [vmem:[#allocation2 + $0x20] sm:$0xff] }
  0x91   : > { %567 = vmatpush.bf16.msra.mxu0 %v562_v40  ;;  %2002 = vmatpush.bf16.msra.mxu1 %v562_v40  ;;  %v538_v15 = vpack.c.bf16 %v520_v11, %v519_v10  ;;  %v498_v17 = vld [vmem:[#allocation2 + $0x28] sm:$0xff]  ;;  %v505_v18 = vld [vmem:[#allocation2 + $0x60] sm:$0xff]  ;;  %v499_v28 = vld [vmem:[#allocation2 + $0x30] sm:$0xff] }
  0x92   : > { %2003 = vmatpush.bf16.msra.mxu2 %v562_v40  ;;  %2004 = vmatpush.bf16.msra.mxu3 %v562_v40  ;;  %v506_v19 = vld [vmem:[#allocation2 + $0x68] sm:$0xff]  ;;  %v513_v20 = vld [vmem:[#allocation2 + $0xa0] sm:$0xff]  ;;  %v527_v24 = vpack.c.bf16 %v498_v17, %v497_v16  ;;  %v500_v29 = vld [vmem:[#allocation2 + $0x38] sm:$0xff] }
  0x93   : > { %v514_v21 = vld [vmem:[#allocation2 + $0xa8] sm:$0xff]  ;;  %v521_v22 = vld [vmem:[#allocation2 + $0xe0] sm:$0xff]  ;;  %v531_v25 = vpack.c.bf16 %v506_v19, %v505_v18  ;;  %v507_v30 = vld [vmem:[#allocation2 + $0x70] sm:$0xff]  ;;  %v528_v36 = vpack.c.bf16 %v500_v29, %v499_v28 }
  0x94   : > { %v522_v23 = vld [vmem:[#allocation2 + $0xe8] sm:$0xff]  ;;  %v535_v26 = vpack.c.bf16 %v514_v21, %v513_v20  ;;  %v508_v31 = vld [vmem:[#allocation2 + $0x78] sm:$0xff]  ;;  %v515_v32 = vld [vmem:[#allocation2 + $0xb0] sm:$0xff] }
  0x95   : > { %568 = vmatpush.bf16.msra.mxu0 %v561_v43  ;;  %2005 = vmatpush.bf16.msra.mxu1 %v561_v43  ;;  %v539_v27 = vpack.c.bf16 %v522_v23, %v521_v22  ;;  %v516_v33 = vld [vmem:[#allocation2 + $0xb8] sm:$0xff]  ;;  %v523_v34 = vld [vmem:[#allocation2 + $0xf0] sm:$0xff]  ;;  %v532_v37 = vpack.c.bf16 %v508_v31, %v507_v30 }
  0x96   : > { %2006 = vmatpush.bf16.msra.mxu2 %v561_v43  ;;  %2007 = vmatpush.bf16.msra.mxu3 %v561_v43  ;;  %v524_v35 = vld [vmem:[#allocation2 + $0xf8] sm:$0xff]  ;;  %v536_v38 = vpack.c.bf16 %v516_v33, %v515_v32 }
  0x97   : > { %v540_v39 = vpack.c.bf16 %v524_v35, %v523_v34 }
  0x99   : > { %569 = vmatpush.bf16.msra.mxu0 %v560_v46  ;;  %2008 = vmatpush.bf16.msra.mxu1 %v560_v46 }
  0x9a   : > { %2009 = vmatpush.bf16.msra.mxu2 %v560_v46  ;;  %2010 = vmatpush.bf16.msra.mxu3 %v560_v46 }
  0x9d   : > { %570 = vmatpush.bf16.msra.mxu0 %v559_v49  ;;  %2011 = vmatpush.bf16.msra.mxu1 %v559_v49 }
  0x9e   : > { %2012 = vmatpush.bf16.msra.mxu2 %v559_v49  ;;  %2013 = vmatpush.bf16.msra.mxu3 %v559_v49 }
  0xa1   : > { %571 = vmatpush.bf16.msra.mxu0 %v558_v52  ;;  %2014 = vmatpush.bf16.msra.mxu1 %v558_v52 }
  0xa2   : > { %2015 = vmatpush.bf16.msra.mxu2 %v558_v52  ;;  %2016 = vmatpush.bf16.msra.mxu3 %v558_v52 }
  0xa5   : > { %572 = vmatpush.bf16.msra.mxu0 %v557_v57  ;;  %2017 = vmatpush.bf16.msra.mxu1 %v557_v57 }
  0xa6   : > { %2018 = vmatpush.bf16.msra.mxu2 %v557_v57  ;;  %2019 = vmatpush.bf16.msra.mxu3 %v557_v57 }
  0xa8   : > { %573 = vmatmul.bf16.vlgmr.msra.gmra.mxu0 %v525_v0  ;;  %593 = vmatmul.bf16.vlgmr.msra.gmra.mxu1 %v529_v1 }
  0xa9   : > { %613 = vmatmul.bf16.vlgmr.msra.gmra.mxu2 %v533_v2  ;;  %633 = vmatmul.bf16.vlgmr.msra.gmra.mxu3 %v537_v3 }
  0xb8   : > { %578 = vmatmul.bf16.gmra.mxu0 %v526_v12  ;;  %598 = vmatmul.bf16.gmra.mxu1 %v530_v13 }
  0xb9   : > { %618 = vmatmul.bf16.gmra.mxu2 %v534_v14  ;;  %638 = vmatmul.bf16.gmra.mxu3 %v538_v15 }
  0xc8   : > { %583 = vmatmul.bf16.gmra.mxu0 %v527_v24  ;;  %603 = vmatmul.bf16.gmra.mxu1 %v531_v25 }
  0xc9   : > { %623 = vmatmul.bf16.gmra.mxu2 %v535_v26  ;;  %643 = vmatmul.bf16.gmra.mxu3 %v539_v27 }
  0xd8   : > { %588 = vmatmul.bf16.gmra.mxu0 %v528_v36  ;;  %608 = vmatmul.bf16.gmra.mxu1 %v532_v37 }
  0xd9   : > { %628 = vmatmul.bf16.gmra.mxu2 %v536_v38  ;;  %648 = vmatmul.bf16.gmra.mxu3 %v540_v39 }
 0x125   : > { %v574_v40 = vpop.f32.mrf.mxu0  ;;  %v594_v41 = vpop.f32.mrf.mxu1 }
 0x12c   : > { %v614_v42 = vpop.f32.mrf.mxu2  ;;  %v634_v43 = vpop.f32.mrf.mxu3 }
 0x12d   : > { %v576_v44 = vpop.f32.mrf.mxu0  ;;  %v596_v45 = vpop.f32.mrf.mxu1 }
 0x12e   : > { %v1904_v46 = vpack.c.bf16 %v576_v44, %v574_v40  ;;  %v1924_v47 = vpack.c.bf16 %v596_v45, %v594_v41 }
 0x130   : > { %1905 = vst [vmem:[#allocation3] sm:$0xff] %v1904_v46  }
 0x131   : > { %1984 = vst [vmem:[#allocation3 + $0x20] sm:$0xff] %v1924_v47  }
 0x134   : > { %v616_v48 = vpop.f32.mrf.mxu2  ;;  %v636_v49 = vpop.f32.mrf.mxu3 }
 0x135   : > { %v1944_v50 = vpack.c.bf16 %v616_v48, %v614_v42  ;;  %v1964_v51 = vpack.c.bf16 %v636_v49, %v634_v43  ;;  %v579_v52 = vpop.f32.mrf.mxu0  ;;  %v599_v53 = vpop.f32.mrf.mxu1 }
 0x137   : > { %1988 = vst [vmem:[#allocation3 + $0x40] sm:$0xff] %v1944_v50  }
 0x138   : > { %1992 = vst [vmem:[#allocation3 + $0x60] sm:$0xff] %v1964_v51  }
 0x13c   : > { %v619_v54 = vpop.f32.mrf.mxu2  ;;  %v639_v55 = vpop.f32.mrf.mxu3 }
 0x13d   : > { %v581_v56 = vpop.f32.mrf.mxu0  ;;  %v601_v57 = vpop.f32.mrf.mxu1 }
 0x13e   : > { %v1909_v58 = vpack.c.bf16 %v581_v56, %v579_v52  ;;  %v1929_v59 = vpack.c.bf16 %v601_v57, %v599_v53 }
 0x140   : > { %1981 = vst [vmem:[#allocation3 + $0x8] sm:$0xff] %v1909_v58  }
 0x141   : > { %1985 = vst [vmem:[#allocation3 + $0x28] sm:$0xff] %v1929_v59  }
 0x144   : > { %v621_v60 = vpop.f32.mrf.mxu2  ;;  %v641_v61 = vpop.f32.mrf.mxu3 }
 0x145   : > { %v1949_v62 = vpack.c.bf16 %v621_v60, %v619_v54  ;;  %v1969_v63 = vpack.c.bf16 %v641_v61, %v639_v55  ;;  %v584_v0 = vpop.f32.mrf.mxu0  ;;  %v604_v1 = vpop.f32.mrf.mxu1 }
 0x147   : > { %1989 = vst [vmem:[#allocation3 + $0x48] sm:$0xff] %v1949_v62  }
 0x148   : > { %1993 = vst [vmem:[#allocation3 + $0x68] sm:$0xff] %v1969_v63  }
 0x14c   : > { %v624_v2 = vpop.f32.mrf.mxu2  ;;  %v644_v3 = vpop.f32.mrf.mxu3 }
 0x14d   : > { %v586_v4 = vpop.f32.mrf.mxu0  ;;  %v606_v5 = vpop.f32.mrf.mxu1 }
 0x14e   : > { %v1914_v6 = vpack.c.bf16 %v586_v4, %v584_v0  ;;  %v1934_v7 = vpack.c.bf16 %v606_v5, %v604_v1 }
 0x150   : > { %1982 = vst [vmem:[#allocation3 + $0x10] sm:$0xff] %v1914_v6  }
 0x151   : > { %1986 = vst [vmem:[#allocation3 + $0x30] sm:$0xff] %v1934_v7  }
 0x154   : > { %v626_v8 = vpop.f32.mrf.mxu2  ;;  %v646_v9 = vpop.f32.mrf.mxu3 }
 0x155   : > { %v1954_v10 = vpack.c.bf16 %v626_v8, %v624_v2  ;;  %v1974_v11 = vpack.c.bf16 %v646_v9, %v644_v3  ;;  %v589_v12 = vpop.f32.mrf.mxu0  ;;  %v609_v13 = vpop.f32.mrf.mxu1 }
 0x157   : > { %1990 = vst [vmem:[#allocation3 + $0x50] sm:$0xff] %v1954_v10  }
 0x158   : > { %1994 = vst [vmem:[#allocation3 + $0x70] sm:$0xff] %v1974_v11  }
 0x15c   : > { %v629_v14 = vpop.f32.mrf.mxu2  ;;  %v649_v15 = vpop.f32.mrf.mxu3 }
 0x15d   : > { %v591_v16 = vpop.f32.mrf.mxu0  ;;  %v611_v17 = vpop.f32.mrf.mxu1 }
 0x15e   : > { %v1919_v18 = vpack.c.bf16 %v591_v16, %v589_v12  ;;  %v1939_v19 = vpack.c.bf16 %v611_v17, %v609_v13 }
 0x160   : > { %1983 = vst [vmem:[#allocation3 + $0x18] sm:$0xff] %v1919_v18  }
 0x161   : > { %1987 = vst [vmem:[#allocation3 + $0x38] sm:$0xff] %v1939_v19  }
 0x164   : > { %v631_v20 = vpop.f32.mrf.mxu2  ;;  %v651_v21 = vpop.f32.mrf.mxu3 }
 0x165   : > { %v1959_v22 = vpack.c.bf16 %v631_v20, %v629_v14  ;;  %v1979_v23 = vpack.c.bf16 %v651_v21, %v649_v15 }
 0x167   : > { %1991 = vst [vmem:[#allocation3 + $0x58] sm:$0xff] %v1959_v22  }
 0x168   : > { %1995 = vst [vmem:[#allocation3 + $0x78] sm:$0xff] %v1979_v23  }
 0x169 PF: > { %s3409_s13 = sld [smem:[#allocation15_spill]] }
 0x16f   : > { %p1812_p0 = scmp.ne.s32.totalorder %s3409_s13, 0 }
 0x171   : > { %720 = sbr.rel (%p1812_p0) target bundleno = 391 (0x187), region = 76 }
 0x176   : > { %v2185_v24 = vld [vmem:[%s363_s4] ss:$0 sm:$0xff] }
 0x177   : > { %725 = vst [vmem:[#allocation4 + $0x30] sm:$0xff] %v2185_v24 }
 0x178   : > { %726 = vst [vmem:[#allocation4] sm:$0xff] %v2185_v24 }
 0x179   : > { %727 = vst [vmem:[#allocation4 + $0x58] sm:$0xff] %v2185_v24 }
 0x17a   : > { %728 = vst [vmem:[#allocation4 + $0x18] sm:$0xff] %v2185_v24 }
 0x17b   : > { %729 = vst [vmem:[#allocation4 + $0x50] sm:$0xff] %v2185_v24 }
 0x17c   : > { %730 = vst [vmem:[#allocation4 + $0x68] sm:$0xff] %v2185_v24 }
 0x17d   : > { %731 = vst [vmem:[#allocation4 + $0x8] sm:$0xff] %v2185_v24 }
 0x17e   : > { %732 = vst [vmem:[#allocation4 + $0x48] sm:$0xff] %v2185_v24 }
 0x17f   : > { %733 = vst [vmem:[#allocation4 + $0x40] sm:$0xff] %v2185_v24 }
 0x180   : > { %734 = vst [vmem:[#allocation4 + $0x20] sm:$0xff] %v2185_v24 }
 0x181   : > { %735 = vst [vmem:[#allocation4 + $0x10] sm:$0xff] %v2185_v24 }
 0x182   : > { %736 = vst [vmem:[#allocation4 + $0x38] sm:$0xff] %v2185_v24 }
 0x183   : > { %737 = vst [vmem:[#allocation4 + $0x60] sm:$0xff] %v2185_v24 }
 0x184   : > { %738 = vst [vmem:[#allocation4 + $0x70] sm:$0xff] %v2185_v24 }
 0x185   : > { %739 = vst [vmem:[#allocation4 + $0x78] sm:$0xff] %v2185_v24 }
 0x186   : > { %740 = vst [vmem:[#allocation4 + $0x28] sm:$0xff] %v2185_v24 }
 0x187 PF: > { %s3410_s20 = sld [smem:[#allocation15_spill]]  ;;  %s773_s28 = sshra.s32 %s1810_s16, 3  ;;  %v1885_v33 = vld [vmem:[%s2706_s17] sm:$0xff]  ;;  %v1887_v34 = vld [vmem:[%s2706_s17 + $0x10] sm:$0xff]  ;;  %v1886_v37 = vld [vmem:[%s2706_s17 + $0x8] sm:$0xff] }
 0x188   : > { %s1813_s29 = sshll.u32 %s773_s28, 2  ;;  %v1889_v35 = vld [vmem:[%s2706_s17 + $0x20] sm:$0xff]  ;;  %v1891_v36 = vld [vmem:[%s2706_s17 + $0x30] sm:$0xff]  ;;  %v1888_v38 = vld [vmem:[%s2706_s17 + $0x18] sm:$0xff] }
 0x189   : > { %s2762_s2 = scalar_lea.vmem [#allocation3], %s1813_s29  ;;  %v1890_v39 = vld [vmem:[%s2706_s17 + $0x28] sm:$0xff]  ;;  %v1892_v40 = vld [vmem:[%s2706_s17 + $0x38] sm:$0xff]  ;;  %v741_v41 = vld [vmem:[#allocation4 + $0x30] sm:$0xff] }
 0x18a   : > { %v1900_v25 = vld [vmem:[%s2762_s2 + $0x38] sm:$0xff]  ;;  %v1899_v26 = vld [vmem:[%s2762_s2 + $0x30] sm:$0xff]  ;;  %v1898_v27 = vld [vmem:[%s2762_s2 + $0x28] sm:$0xff] }
 0x18b   : > { %889 = vmatpush.bf16.msra.mxu0 %v1900_v25  ;;  %2020 = vmatpush.bf16.msra.mxu1 %v1900_v25  ;;  %v1897_v28 = vld [vmem:[%s2762_s2 + $0x20] sm:$0xff]  ;;  %v1896_v29 = vld [vmem:[%s2762_s2 + $0x18] sm:$0xff]  ;;  %v1895_v30 = vld [vmem:[%s2762_s2 + $0x10] sm:$0xff] }
 0x18c   : > { %2021 = vmatpush.bf16.msra.mxu2 %v1900_v25  ;;  %2022 = vmatpush.bf16.msra.mxu3 %v1900_v25  ;;  %v1894_v31 = vld [vmem:[%s2762_s2 + $0x8] sm:$0xff]  ;;  %v1893_v32 = vld [vmem:[%s2762_s2] sm:$0xff]  ;;  %v745_v42 = vld [vmem:[#allocation4 + $0x50] sm:$0xff] }
 0x18d   : > { %p970_p1 = scmp.eq.s32.totalorder %s3410_s20, 1  ;;  %v749_v47 = vld [vmem:[#allocation4 + $0x40] sm:$0xff]  ;;  %v746_v50 = vld [vmem:[#allocation4 + $0x68] sm:$0xff]  ;;  %v754_v60 = vld [vmem:[#allocation4 + $0x70] sm:$0xff]  ;;  %p1878_p2 = scmp.ne.s32.totalorder %s3410_s20, 1 }
 0x18e   : > { %v753_v48 = vld [vmem:[#allocation4 + $0x60] sm:$0xff]  ;;  %v743_v61 = vld [vmem:[#allocation4 + $0x58] sm:$0xff]  ;;  %v747_v62 = vld [vmem:[#allocation4 + $0x8] sm:$0xff]  ;;  %s990_s3 = scalar_lea.vmem (!%p1878_p2), [#allocation2], %s1809_s15 }
 0x18f   : > { %890 = vmatpush.bf16.msra.mxu0 %v1899_v26  ;;  %2023 = vmatpush.bf16.msra.mxu1 %v1899_v26  ;;  %v742_v49 = vld [vmem:[#allocation4] sm:$0xff]  ;;  %v751_v7 = vld [vmem:[#allocation4 + $0x10] sm:$0xff]  ;;  %v755_v8 = vld [vmem:[#allocation4 + $0x78] sm:$0xff] }
 0x190   : > { %2024 = vmatpush.bf16.msra.mxu2 %v1899_v26  ;;  %2025 = vmatpush.bf16.msra.mxu3 %v1899_v26  ;;  %v750_v59 = vld [vmem:[#allocation4 + $0x20] sm:$0xff]  ;;  %v744_v9 = vld [vmem:[#allocation4 + $0x18] sm:$0xff]  ;;  %v748_v10 = vld [vmem:[#allocation4 + $0x48] sm:$0xff] }
 0x191   : > { %v752_v19 = vld [vmem:[#allocation4 + $0x38] sm:$0xff]  ;;  %v756_v20 = vld [vmem:[#allocation4 + $0x28] sm:$0xff] }
 0x193   : > { %891 = vmatpush.bf16.msra.mxu0 %v1898_v27  ;;  %2026 = vmatpush.bf16.msra.mxu1 %v1898_v27 }
 0x194   : > { %2027 = vmatpush.bf16.msra.mxu2 %v1898_v27  ;;  %2028 = vmatpush.bf16.msra.mxu3 %v1898_v27 }
 0x197   : > { %892 = vmatpush.bf16.msra.mxu0 %v1897_v28  ;;  %2029 = vmatpush.bf16.msra.mxu1 %v1897_v28 }
 0x198   : > { %2030 = vmatpush.bf16.msra.mxu2 %v1897_v28  ;;  %2031 = vmatpush.bf16.msra.mxu3 %v1897_v28 }
 0x19b   : > { %893 = vmatpush.bf16.msra.mxu0 %v1896_v29  ;;  %2032 = vmatpush.bf16.msra.mxu1 %v1896_v29 }
 0x19c   : > { %2033 = vmatpush.bf16.msra.mxu2 %v1896_v29  ;;  %2034 = vmatpush.bf16.msra.mxu3 %v1896_v29 }
 0x19f   : > { %894 = vmatpush.bf16.msra.mxu0 %v1895_v30  ;;  %2035 = vmatpush.bf16.msra.mxu1 %v1895_v30 }
 0x1a0   : > { %2036 = vmatpush.bf16.msra.mxu2 %v1895_v30  ;;  %2037 = vmatpush.bf16.msra.mxu3 %v1895_v30 }
 0x1a3   : > { %895 = vmatpush.bf16.msra.mxu0 %v1894_v31  ;;  %2038 = vmatpush.bf16.msra.mxu1 %v1894_v31 }
 0x1a4   : > { %2039 = vmatpush.bf16.msra.mxu2 %v1894_v31  ;;  %2040 = vmatpush.bf16.msra.mxu3 %v1894_v31 }
 0x1a7   : > { %896 = vmatpush.bf16.msra.mxu0 %v1893_v32  ;;  %2041 = vmatpush.bf16.msra.mxu1 %v1893_v32 }
 0x1a8   : > { %2042 = vmatpush.bf16.msra.mxu2 %v1893_v32  ;;  %2043 = vmatpush.bf16.msra.mxu3 %v1893_v32 }
 0x1aa   : > { %897 = vmatmul.bf16.vlgmr.msra.gmra.mxu0 %v1885_v33  ;;  %907 = vmatmul.bf16.vlgmr.msra.gmra.mxu1 %v1887_v34 }
 0x1ab   : > { %917 = vmatmul.bf16.vlgmr.msra.gmra.mxu2 %v1889_v35  ;;  %927 = vmatmul.bf16.vlgmr.msra.gmra.mxu3 %v1891_v36 }
 0x1ba   : > { %902 = vmatmul.bf16.gmra.mxu0 %v1886_v37  ;;  %912 = vmatmul.bf16.gmra.mxu1 %v1888_v38 }
 0x1bb   : > { %922 = vmatmul.bf16.gmra.mxu2 %v1890_v39  ;;  %932 = vmatmul.bf16.gmra.mxu3 %v1892_v40 }
 0x227   : > { %v898_v43 = vpop.f32.mrf.mxu0  ;;  %v908_v44 = vpop.f32.mrf.mxu1 }
 0x228   : > { %v938_v45 = vadd.f32 %v898_v43, %v741_v41  ;;  %v942_v46 = vadd.f32 %v908_v44, %v745_v42 }
 0x22a   : > { %954 = vst [vmem:[#allocation4 + $0x30] sm:$0xff] %v938_v45 }
 0x22b   : > { %958 = vst [vmem:[#allocation4 + $0x50] sm:$0xff] %v942_v46 }
 0x22e   : > { %v918_v51 = vpop.f32.mrf.mxu2  ;;  %v928_v52 = vpop.f32.mrf.mxu3 }
 0x22f   : > { %v946_v53 = vadd.f32 %v918_v51, %v749_v47  ;;  %v950_v54 = vadd.f32 %v928_v52, %v753_v48  ;;  %v900_v55 = vpop.f32.mrf.mxu0  ;;  %v910_v56 = vpop.f32.mrf.mxu1 }
 0x230   : > { %v939_v57 = vadd.f32 %v900_v55, %v742_v49  ;;  %v943_v58 = vadd.f32 %v910_v56, %v746_v50 }
 0x231   : > { %962 = vst [vmem:[#allocation4 + $0x40] sm:$0xff] %v946_v53 }
 0x232   : > { %966 = vst [vmem:[#allocation4 + $0x60] sm:$0xff] %v950_v54 }
 0x233   : > { %955 = vst [vmem:[#allocation4] sm:$0xff] %v939_v57 }
 0x234   : > { %959 = vst [vmem:[#allocation4 + $0x68] sm:$0xff] %v943_v58 }
 0x236   : > { %v920_v63 = vpop.f32.mrf.mxu2  ;;  %v930_v0 = vpop.f32.mrf.mxu3 }
 0x237   : > { %v947_v1 = vadd.f32 %v920_v63, %v750_v59  ;;  %v951_v2 = vadd.f32 %v930_v0, %v754_v60  ;;  %v903_v3 = vpop.f32.mrf.mxu0  ;;  %v913_v4 = vpop.f32.mrf.mxu1 }
 0x238   : > { %v940_v5 = vadd.f32 %v903_v3, %v743_v61  ;;  %v944_v6 = vadd.f32 %v913_v4, %v747_v62 }
 0x239   : > { %963 = vst [vmem:[#allocation4 + $0x20] sm:$0xff] %v947_v1 }
 0x23a   : > { %967 = vst [vmem:[#allocation4 + $0x70] sm:$0xff] %v951_v2 }
 0x23b   : > { %956 = vst [vmem:[#allocation4 + $0x58] sm:$0xff] %v940_v5 }
 0x23c   : > { %960 = vst [vmem:[#allocation4 + $0x8] sm:$0xff] %v944_v6 }
 0x23e   : > { %v923_v11 = vpop.f32.mrf.mxu2  ;;  %v933_v12 = vpop.f32.mrf.mxu3 }
 0x23f   : > { %v948_v13 = vadd.f32 %v923_v11, %v751_v7  ;;  %v952_v14 = vadd.f32 %v933_v12, %v755_v8  ;;  %v905_v15 = vpop.f32.mrf.mxu0  ;;  %v915_v16 = vpop.f32.mrf.mxu1 }
 0x240   : > { %v941_v17 = vadd.f32 %v905_v15, %v744_v9  ;;  %v945_v18 = vadd.f32 %v915_v16, %v748_v10 }
 0x241   : > { %964 = vst [vmem:[#allocation4 + $0x10] sm:$0xff] %v948_v13 }
 0x242   : > { %968 = vst [vmem:[#allocation4 + $0x78] sm:$0xff] %v952_v14 }
 0x243   : > { %957 = vst [vmem:[#allocation4 + $0x18] sm:$0xff] %v941_v17 }
 0x244   : > { %961 = vst [vmem:[#allocation4 + $0x48] sm:$0xff] %v945_v18 }
 0x246   : > { %v925_v21 = vpop.f32.mrf.mxu2  ;;  %v935_v22 = vpop.f32.mrf.mxu3  ;;  %973 = sbr.rel (%p1878_p2) target bundleno = 604 (0x25c), region = 80 }
 0x247   : > { %v949_v23 = vadd.f32 %v925_v21, %v752_v19  ;;  %v953_v24 = vadd.f32 %v935_v22, %v756_v20 }
 0x249   : > { %965 = vst [vmem:[#allocation4 + $0x38] sm:$0xff] %v949_v23 }
 0x24a   : > { %969 = vst [vmem:[#allocation4 + $0x28] sm:$0xff] %v953_v24 }
 0x24b   : > { %v974_v25 = vld [vmem:[#allocation4 + $0x30] sm:$0xff]  ;;  %v975_v26 = vld [vmem:[#allocation4] sm:$0xff]  ;;  %v976_v27 = vld [vmem:[#allocation4 + $0x58] sm:$0xff] }
 0x24c   : > { %991 = vst [vmem:[%s990_s3] sm:$0xff] %v974_v25  ;;  %v977_v28 = vld [vmem:[#allocation4 + $0x18] sm:$0xff]  ;;  %v978_v29 = vld [vmem:[#allocation4 + $0x50] sm:$0xff]  ;;  %v979_v30 = vld [vmem:[#allocation4 + $0x68] sm:$0xff] }
 0x24d   : > { %992 = vst [vmem:[%s990_s3 + $0x8] sm:$0xff] %v975_v26  ;;  %v980_v31 = vld [vmem:[#allocation4 + $0x8] sm:$0xff]  ;;  %v982_v33 = vld [vmem:[#allocation4 + $0x40] sm:$0xff]  ;;  %v984_v35 = vld [vmem:[#allocation4 + $0x10] sm:$0xff] }
 0x24e   : > { %993 = vst [vmem:[%s990_s3 + $0x10] sm:$0xff] %v976_v27  ;;  %v981_v32 = vld [vmem:[#allocation4 + $0x48] sm:$0xff]  ;;  %v983_v34 = vld [vmem:[#allocation4 + $0x20] sm:$0xff]  ;;  %v987_v38 = vld [vmem:[#allocation4 + $0x70] sm:$0xff] }
 0x24f   : > { %994 = vst [vmem:[%s990_s3 + $0x18] sm:$0xff] %v977_v28  ;;  %v986_v37 = vld [vmem:[#allocation4 + $0x60] sm:$0xff]  ;;  %v988_v39 = vld [vmem:[#allocation4 + $0x78] sm:$0xff] }
 0x250   : > { %995 = vst [vmem:[%s990_s3 + $0x20] sm:$0xff] %v978_v29  ;;  %v985_v36 = vld [vmem:[#allocation4 + $0x38] sm:$0xff] }
 0x251   : > { %996 = vst [vmem:[%s990_s3 + $0x28] sm:$0xff] %v979_v30  ;;  %v989_v40 = vld [vmem:[#allocation4 + $0x28] sm:$0xff] }
 0x252   : > { %997 = vst [vmem:[%s990_s3 + $0x30] sm:$0xff] %v980_v31 }
 0x253   : > { %998 = vst [vmem:[%s990_s3 + $0x38] sm:$0xff] %v981_v32 }
 0x254   : > { %999 = vst [vmem:[%s990_s3 + $0x40] sm:$0xff] %v982_v33 }
 0x255   : > { %1000 = vst [vmem:[%s990_s3 + $0x48] sm:$0xff] %v983_v34 }
 0x256   : > { %1001 = vst [vmem:[%s990_s3 + $0x50] sm:$0xff] %v984_v35 }
 0x257   : > { %1002 = vst [vmem:[%s990_s3 + $0x58] sm:$0xff] %v985_v36 }
 0x258   : > { %1003 = vst [vmem:[%s990_s3 + $0x60] sm:$0xff] %v986_v37 }
 0x259   : > { %1004 = vst [vmem:[%s990_s3 + $0x68] sm:$0xff] %v987_v38 }
 0x25a   : > { %1005 = vst [vmem:[%s990_s3 + $0x70] sm:$0xff] %v988_v39 }
 0x25b   : > { %1006 = vst [vmem:[%s990_s3 + $0x78] sm:$0xff] %v989_v40 }
 0x25c PF: > { %s3412_s30 = sld [smem:[#allocation16_spill]] }
 0x262   : > { %p1007_p3 = scmp.eq.s32.totalorder %s3412_s30, 1 }
 0x264   : > { %p1008_p4 = pnand %p1007_p3, %p970_p1 }
 0x265   : > { %s3414_s19 = sld [smem:[#allocation17_spill]] (!%p1008_p4) }
 0x266   : > { %1011 = sbr.rel (%p1008_p4) target bundleno = 890 (0x37a), region = 84 }
 0x26b   : > { %p1879_p6 = scmp.ge.s32.totalorder %s3414_s19, 2 }
 0x26d   : > { %1015 = sbr.rel (%p1879_p6) target bundleno = 844 (0x34c), region = 88 }
 0x272   : > { %v2788_v41 = vld [vmem:[#allocation2] sm:$0xff]  ;;  %v2790_v42 = vld [vmem:[#allocation2 + $0x8] sm:$0xff]  ;;  %v2792_v43 = vld [vmem:[#allocation2 + $0x10] sm:$0xff] }
 0x273   : > { %v1209_v44 = vadd.f32 %v2790_v42, %v2788_v41  ;;  %v2796_v45 = vld [vmem:[#allocation2 + $0x18] sm:$0xff]  ;;  %v2799_v47 = vld [vmem:[#allocation2 + $0x20] sm:$0xff]  ;;  %v2802_v49 = vld [vmem:[#allocation2 + $0x28] sm:$0xff] }
 0x274   : > { %v2805_v51 = vld [vmem:[#allocation2 + $0x30] sm:$0xff]  ;;  %v2808_v53 = vld [vmem:[#allocation2 + $0x38] sm:$0xff]  ;;  %v2811_v55 = vld [vmem:[#allocation2 + $0x40] sm:$0xff] }
 0x275   : > { %v1210_v46 = vadd.f32 %v1209_v44, %v2792_v43  ;;  %v2814_v57 = vld [vmem:[#allocation2 + $0x48] sm:$0xff]  ;;  %v2817_v59 = vld [vmem:[#allocation2 + $0x50] sm:$0xff]  ;;  %v2820_v61 = vld [vmem:[#allocation2 + $0x58] sm:$0xff] }
 0x276   : > { %v2823_v63 = vld [vmem:[#allocation2 + $0x60] sm:$0xff]  ;;  %v2826_v1 = vld [vmem:[#allocation2 + $0x68] sm:$0xff]  ;;  %v2829_v3 = vld [vmem:[#allocation2 + $0x70] sm:$0xff] }
 0x277   : > { %v1211_v48 = vadd.f32 %v1210_v46, %v2796_v45  ;;  %v2832_v5 = vld [vmem:[#allocation2 + $0x78] sm:$0xff]  ;;  %v2835_v7 = vld [vmem:[#allocation2 + $0x80] sm:$0xff]  ;;  %v2838_v9 = vld [vmem:[#allocation2 + $0x88] sm:$0xff] }
 0x278   : > { %v2841_v11 = vld [vmem:[#allocation2 + $0x90] sm:$0xff]  ;;  %v2844_v13 = vld [vmem:[#allocation2 + $0x98] sm:$0xff]  ;;  %v2847_v15 = vld [vmem:[#allocation2 + $0xa0] sm:$0xff] }
 0x279   : > { %v1212_v50 = vadd.f32 %v1211_v48, %v2799_v47  ;;  %v2850_v17 = vld [vmem:[#allocation2 + $0xa8] sm:$0xff]  ;;  %v2853_v19 = vld [vmem:[#allocation2 + $0xb0] sm:$0xff]  ;;  %v2856_v21 = vld [vmem:[#allocation2 + $0xb8] sm:$0xff] }
 0x27a   : > { %v2858_v22 = vld [vmem:[#allocation2 + $0xc8] sm:$0xff]  ;;  %v2861_v24 = vld [vmem:[#allocation2 + $0xc0] sm:$0xff]  ;;  %v2863_v25 = vld [vmem:[#allocation2 + $0xd0] sm:$0xff] }
 0x27b   : > { %v1213_v52 = vadd.f32 %v1212_v50, %v2802_v49  ;;  %v1202_v26 = vmul.f32 0.0, %v2858_v22  ;;  %v2867_v28 = vld [vmem:[#allocation2 + $0xd8] sm:$0xff]  ;;  %v1203_v29 = vmul.f32 0.0, %v2863_v25  ;;  %v2871_v31 = vld [vmem:[#allocation2 + $0xe0] sm:$0xff]  ;;  %v2874_v34 = vld [vmem:[#allocation2 + $0xe8] sm:$0xff] }
 0x27c   : > { %v1204_v32 = vmul.f32 0.0, %v2867_v28  ;;  %v1205_v35 = vmul.f32 0.0, %v2871_v31  ;;  %v2877_v37 = vld [vmem:[#allocation2 + $0xf0] sm:$0xff]  ;;  %v1206_v38 = vmul.f32 0.0, %v2874_v34  ;;  %v2880_v40 = vld [vmem:[#allocation2 + $0xf8] sm:$0xff] }
 0x27d   : > { %v1214_v54 = vadd.f32 %v1213_v52, %v2805_v51  ;;  %v1207_v44 = vmul.f32 0.0, %v2877_v37  ;;  %v1208_v48 = vmul.f32 0.0, %v2880_v40 }
 0x27f   : > { %v1215_v56 = vadd.f32 %v1214_v54, %v2808_v53 }
 0x281   : > { %v1216_v58 = vadd.f32 %v1215_v56, %v2811_v55 }
 0x283   : > { %v1217_v60 = vadd.f32 %v1216_v58, %v2814_v57 }
 0x285   : > { %v1218_v62 = vadd.f32 %v1217_v60, %v2817_v59 }
 0x287   : > { %v1219_v0 = vadd.f32 %v1218_v62, %v2820_v61 }
 0x289   : > { %v1220_v2 = vadd.f32 %v1219_v0, %v2823_v63 }
 0x28b   : > { %v1221_v4 = vadd.f32 %v1220_v2, %v2826_v1 }
 0x28d   : > { %v1222_v6 = vadd.f32 %v1221_v4, %v2829_v3 }
 0x28f   : > { %v1223_v8 = vadd.f32 %v1222_v6, %v2832_v5 }
 0x291   : > { %v1224_v10 = vadd.f32 %v1223_v8, %v2835_v7 }
 0x293   : > { %v1225_v12 = vadd.f32 %v1224_v10, %v2838_v9 }
 0x295   : > { %v1226_v14 = vadd.f32 %v1225_v12, %v2841_v11 }
 0x297   : > { %v1227_v16 = vadd.f32 %v1226_v14, %v2844_v13 }
 0x299   : > { %v1228_v18 = vadd.f32 %v1227_v16, %v2847_v15 }
 0x29b   : > { %v1229_v20 = vadd.f32 %v1228_v18, %v2850_v17 }
 0x29d   : > { %v1230_v23 = vadd.f32 %v1229_v20, %v2853_v19 }
 0x29f   : > { %v1231_v27 = vadd.f32 %v1230_v23, %v2856_v21 }
 0x2a1   : > { %v1232_v30 = vadd.f32 %v1231_v27, %v2861_v24 }
 0x2a3   : > { %v1233_v33 = vadd.f32 %v1232_v30, %v1202_v26 }
 0x2a5   : > { %v1234_v36 = vadd.f32 %v1233_v33, %v1203_v29 }
 0x2a7   : > { %v1235_v39 = vadd.f32 %v1234_v36, %v1204_v32 }
 0x2a9   : > { %v1236_v46 = vadd.f32 %v1235_v39, %v1205_v35 }
 0x2ab   : > { %v1237_v50 = vadd.f32 %v1236_v46, %v1206_v38 }
 0x2ad   : > { %v1238_v52 = vadd.f32 %v1237_v50, %v1207_v44 }
 0x2af   : > { %v1239_v54 = vadd.f32 %v1238_v52, %v1208_v48 }
 0x2b1   : > { %v1240_v56 = vrot.slane %v1239_v54, 4 }
 0x2b3   : > { %v1241_v58 = vadd.f32 %v1240_v56, %v1239_v54 }
 0x2b5   : > { %v1242_v60 = vrot.slane %v1241_v58, 2 }
 0x2b7   : > { %v1243_v62 = vadd.f32 %v1242_v60, %v1241_v58 }
 0x2b9   : > { %v1244_v0 = vrot.slane %v1243_v62, 1 }
 0x2bb   : > { %v1245_v2 = vadd.f32 %v1244_v0, %v1243_v62 }
 0x2bd   : > { %v2884_v4 = vmul.f32 0.005, %v1245_v2 }
 0x2bf   : > { %v2888_v6 = vsub.f32 %v2788_v41, %v2884_v4  ;;  %v2892_v8 = vsub.f32 %v2790_v42, %v2884_v4  ;;  %v2896_v10 = vsub.f32 %v2792_v43, %v2884_v4  ;;  %v2900_v12 = vsub.f32 %v2796_v45, %v2884_v4 }
 0x2c0   : > { %v2908_v41 = vsub.f32 %v2799_v47, %v2884_v4  ;;  %v2914_v43 = vsub.f32 %v2802_v49, %v2884_v4  ;;  %v2920_v20 = vsub.f32 %v2805_v51, %v2884_v4  ;;  %v2926_v26 = vsub.f32 %v2808_v53, %v2884_v4 }
 0x2c1   : > { %v1279_v14 = vmul.f32 %v2888_v6, %v2888_v6  ;;  %v1280_v16 = vmul.f32 %v2892_v8, %v2892_v8  ;;  %v1281_v42 = vmul.f32 %v2896_v10, %v2896_v10  ;;  %v1282_v45 = vmul.f32 %v2900_v12, %v2900_v12 }
 0x2c2   : > { %v1283_v23 = vmul.f32 %v2908_v41, %v2908_v41  ;;  %v1284_v49 = vmul.f32 %v2914_v43, %v2914_v43  ;;  %v2932_v29 = vsub.f32 %v2811_v55, %v2884_v4  ;;  %v1285_v51 = vmul.f32 %v2920_v20, %v2920_v20 }
 0x2c3   : > { %v1343_v18 = vadd.f32 %v1280_v16, %v1279_v14  ;;  %v2938_v32 = vsub.f32 %v2814_v57, %v2884_v4  ;;  %v1286_v53 = vmul.f32 %v2926_v26, %v2926_v26  ;;  %v2944_v35 = vsub.f32 %v2817_v59, %v2884_v4 }
 0x2c4   : > { %v1287_v55 = vmul.f32 %v2932_v29, %v2932_v29  ;;  %v2950_v38 = vsub.f32 %v2820_v61, %v2884_v4  ;;  %v2956_v44 = vsub.f32 %v2823_v63, %v2884_v4  ;;  %v2962_v48 = vsub.f32 %v2826_v1, %v2884_v4 }
 0x2c5   : > { %v1344_v47 = vadd.f32 %v1343_v18, %v1281_v42  ;;  %v1288_v57 = vmul.f32 %v2938_v32, %v2938_v32  ;;  %v1289_v59 = vmul.f32 %v2944_v35, %v2944_v35  ;;  %v2968_v52 = vsub.f32 %v2829_v3, %v2884_v4 }
 0x2c6   : > { %v1290_v61 = vmul.f32 %v2950_v38, %v2950_v38  ;;  %v1291_v63 = vmul.f32 %v2956_v44, %v2956_v44  ;;  %v2974_v56 = vsub.f32 %v2832_v5, %v2884_v4  ;;  %v1292_v1 = vmul.f32 %v2962_v48, %v2962_v48 }
 0x2c7   : > { %v1345_v27 = vadd.f32 %v1344_v47, %v1282_v45  ;;  %v2980_v60 = vsub.f32 %v2835_v7, %v2884_v4  ;;  %v1293_v3 = vmul.f32 %v2968_v52, %v2968_v52  ;;  %v2986_v0 = vsub.f32 %v2838_v9, %v2884_v4 }
 0x2c8   : > { %v1294_v5 = vmul.f32 %v2974_v56, %v2974_v56  ;;  %v2992_v14 = vsub.f32 %v2841_v11, %v2884_v4  ;;  %v2998_v42 = vsub.f32 %v2844_v13, %v2884_v4  ;;  %v3004_v18 = vsub.f32 %v2847_v15, %v2884_v4 }
 0x2c9   : > { %v1346_v30 = vadd.f32 %v1345_v27, %v1283_v23  ;;  %v1295_v7 = vmul.f32 %v2980_v60, %v2980_v60  ;;  %v1296_v9 = vmul.f32 %v2986_v0, %v2986_v0  ;;  %v3010_v47 = vsub.f32 %v2850_v17, %v2884_v4 }
 0x2ca   : > { %v1297_v11 = vmul.f32 %v2992_v14, %v2992_v14  ;;  %v1298_v13 = vmul.f32 %v2998_v42, %v2998_v42  ;;  %v3016_v27 = vsub.f32 %v2853_v19, %v2884_v4  ;;  %v1299_v15 = vmul.f32 %v3004_v18, %v3004_v18 }
 0x2cb   : > { %v1347_v33 = vadd.f32 %v1346_v30, %v1284_v49  ;;  %v3022_v30 = vsub.f32 %v2856_v21, %v2884_v4  ;;  %v3026_v17 = vsub.f32 %v2858_v22, %v2884_v4  ;;  %v3032_v19 = vsub.f32 %v2861_v24, %v2884_v4 }
 0x2cc   : > { %v1301_v21 = vmul.f32 %v3016_v27, %v3016_v27  ;;  %v3042_v22 = vsub.f32 %v2867_v28, %v2884_v4  ;;  %v3058_v28 = vsub.f32 %v2874_v34, %v2884_v4 }
 0x2cd   : > { %v1348_v36 = vadd.f32 %v1347_v33, %v1285_v51 }
 0x2ce   : > { %v1308_v34 = vmul.f32 %v3058_v28, %v3058_v28 }
 0x2cf   : > { %v1349_v39 = vadd.f32 %v1348_v36, %v1286_v53  ;;  %v1300_v53 = vmul.f32 %v3010_v47, %v3010_v47 }
 0x2d1   : > { %v1350_v46 = vadd.f32 %v1349_v39, %v1287_v55  ;;  %v3036_v55 = vsub.f32 %v2863_v25, %v2884_v4  ;;  %v1304_v39 = vmul.f32 %v3026_v17, %v3026_v17  ;;  %v1303_v25 = vmul.f32 %v3032_v19, %v3032_v19 }
 0x2d3   : > { %v1351_v50 = vadd.f32 %v1350_v46, %v1288_v57  ;;  %v1302_v57 = vmul.f32 %v3022_v30, %v3022_v30  ;;  %v1305_v46 = vmul.f32 %v3036_v55, %v3036_v55 }
 0x2d5   : > { %v1352_v54 = vadd.f32 %v1351_v50, %v1289_v59  ;;  %v3050_v59 = vsub.f32 %v2871_v31, %v2884_v4  ;;  %v1306_v50 = vmul.f32 %v3042_v22, %v3042_v22  ;;  %v3064_v31 = vsub.f32 %v2877_v37, %v2884_v4 }
 0x2d7   : > { %v1353_v58 = vadd.f32 %v1352_v54, %v1290_v61 }
 0x2d9   : > { %v1354_v62 = vadd.f32 %v1353_v58, %v1291_v63  ;;  %v1336_v63 = vmul.f32 0.0, %v1304_v39  ;;  %v1337_v58 = vmul.f32 0.0, %v1305_v46 }
 0x2db   : > { %v1355_v2 = vadd.f32 %v1354_v62, %v1292_v1  ;;  %v1307_v1 = vmul.f32 %v3050_v59, %v3050_v59  ;;  %v3070_v62 = vsub.f32 %v2880_v40, %v2884_v4 }
 0x2dd   : > { %v1356_v16 = vadd.f32 %v1355_v2, %v1293_v3 }
 0x2df   : > { %v1357_v45 = vadd.f32 %v1356_v16, %v1294_v5  ;;  %v1338_v5 = vmul.f32 0.0, %v1306_v50  ;;  %v1339_v16 = vmul.f32 0.0, %v1307_v1 }
 0x2e1   : > { %v1358_v23 = vadd.f32 %v1357_v45, %v1295_v7  ;;  %v1309_v7 = vmul.f32 %v3064_v31, %v3064_v31  ;;  %v1340_v45 = vmul.f32 0.0, %v1308_v34 }
 0x2e3   : > { %v1359_v49 = vadd.f32 %v1358_v23, %v1296_v9  ;;  %v1310_v9 = vmul.f32 %v3070_v62, %v3070_v62  ;;  %v1341_v23 = vmul.f32 0.0, %v1309_v7 }
 0x2e5   : > { %v1360_v51 = vadd.f32 %v1359_v49, %v1297_v11  ;;  %v1342_v49 = vmul.f32 0.0, %v1310_v9  ;;  %v3106_v9 = vld [vmem:[%s372_s21] ss:$0 sm:$0xff] }
 0x2e7   : > { %v1361_v33 = vadd.f32 %v1360_v51, %v1298_v13 }
 0x2e9   : > { %v1362_v36 = vadd.f32 %v1361_v33, %v1299_v15 }
 0x2eb   : > { %v1363_v24 = vadd.f32 %v1362_v36, %v1300_v53 }
 0x2ed   : > { %v1364_v61 = vadd.f32 %v1363_v24, %v1301_v21 }
 0x2ef   : > { %v1365_v54 = vadd.f32 %v1364_v61, %v1302_v57 }
 0x2f1   : > { %v1366_v3 = vadd.f32 %v1365_v54, %v1303_v25 }
 0x2f3   : > { %v1367_v2 = vadd.f32 %v1366_v3, %v1336_v63  ;;  %v3087_v3 = vld [vmem:[%s416_s12] ss:$0 sm:$0xff] }
 0x2f5   : > { %v1368_v37 = vadd.f32 %v1367_v2, %v1337_v58 }
 0x2f7   : > { %v1369_v11 = vadd.f32 %v1368_v37, %v1338_v5 }
 0x2f9   : > { %v1370_v13 = vadd.f32 %v1369_v11, %v1339_v16 }
 0x2fb   : > { %v1371_v40 = vadd.f32 %v1370_v13, %v1340_v45 }
 0x2fd   : > { %v1372_v4 = vadd.f32 %v1371_v40, %v1341_v23 }
 0x2ff   : > { %v1373_v15 = vadd.f32 %v1372_v4, %v1342_v49 }
 0x301   : > { %v1374_v51 = vrot.slane %v1373_v15, 4 }
 0x303   : > { %v1375_v53 = vadd.f32 %v1374_v51, %v1373_v15 }
 0x305   : > { %v1376_v33 = vrot.slane %v1375_v53, 2 }
 0x307   : > { %v1377_v21 = vadd.f32 %v1376_v33, %v1375_v53 }
 0x309   : > { %v1378_v36 = vrot.slane %v1377_v21, 1 }
 0x30b   : > { %v1379_v57 = vadd.f32 %v1378_v36, %v1377_v21 }
 0x30d   : > { %v1380_v39 = vmul.f32 0.005, %v1379_v57 }
 0x30f   : > { %v1381_v24 = vadd.f32 1e-05, %v1380_v39 }
 0x311   : > { %2188 = vrsqrt.f32 %v1381_v24  ;;  %vm1388_vm0 = vweird.f32 %v1381_v24 }
 0x317   : > { %v2189_v25 = vpop.eup %2188 }
 0x318   : > { %v1383_v46 = vmul.f32 %v2189_v25, %v1381_v24  ;;  %vm1389_vm1 = vweird.f32 %v2189_v25 }
 0x319   : > { %vm1390_vm2 = vmor %vm1388_vm0, %vm1389_vm1 }
 0x31a   : > { %v1384_v61 = vmul.f32 %v2189_v25, %v1383_v46 }
 0x31c   : > { %v1385_v50 = vmul.f32 0.5, %v1384_v61 }
 0x31e   : > { %v1386_v63 = vsub.f32 1.5, %v1385_v50 }
 0x320   : > { %v1387_v54 = vmul.f32 %v2189_v25, %v1386_v63 }
 0x322   : > { %v3078_v1 = vsel %vm1390_vm2, %v2189_v25, %v1387_v54 }
 0x323   : > { %v1392_v58 = vmul.f32 %v3078_v1, %v2888_v6  ;;  %v1393_v34 = vmul.f32 %v3078_v1, %v2892_v8  ;;  %v1394_v5 = vmul.f32 %v3078_v1, %v2896_v10  ;;  %v1395_v2 = vmul.f32 %v3078_v1, %v2900_v12 }
 0x324   : > { %v1396_v7 = vmul.f32 %v3078_v1, %v2908_v41  ;;  %v1397_v6 = vmul.f32 %v3078_v1, %v2914_v43  ;;  %v1398_v16 = vmul.f32 %v3078_v1, %v2920_v20  ;;  %v1399_v37 = vmul.f32 %v3078_v1, %v2926_v26 }
 0x325   : > { %v1428_v8 = vmul.f32 %v3087_v3, %v1392_v58  ;;  %v1429_v10 = vmul.f32 %v3087_v3, %v1393_v34  ;;  %v1430_v12 = vmul.f32 %v3087_v3, %v1394_v5  ;;  %v1431_v41 = vmul.f32 %v3087_v3, %v1395_v2 }
 0x326   : > { %v1432_v45 = vmul.f32 %v3087_v3, %v1396_v7  ;;  %v1433_v43 = vmul.f32 %v3087_v3, %v1397_v6  ;;  %v1434_v20 = vmul.f32 %v3087_v3, %v1398_v16  ;;  %v1435_v11 = vmul.f32 %v3087_v3, %v1399_v37 }
 0x327   : > { %v1464_v26 = vadd.f32 %v3106_v9, %v1428_v8  ;;  %v1465_v23 = vadd.f32 %v3106_v9, %v1429_v10  ;;  %v1466_v13 = vadd.f32 %v3106_v9, %v1430_v12  ;;  %v1467_v49 = vadd.f32 %v3106_v9, %v1431_v41 }
 0x328   : > { %v1468_v40 = vadd.f32 %v3106_v9, %v1432_v45  ;;  %v1469_v4 = vadd.f32 %v3106_v9, %v1433_v43  ;;  %v1470_v15 = vadd.f32 %v3106_v9, %v1434_v20  ;;  %v1471_v51 = vadd.f32 %v3106_v9, %v1435_v11 }
 0x329   : > { %v1496_v53 = vmax.f32 %v1464_v26, 0.0  ;;  %v1497_v33 = vmax.f32 %v1465_v23, 0.0  ;;  %v1498_v21 = vmax.f32 %v1466_v13, 0.0  ;;  %v1499_v36 = vmax.f32 %v1467_v49, 0.0 }
 0x32a   : > { %v1500_v57 = vmax.f32 %v1468_v40, 0.0  ;;  %v1501_v39 = vmax.f32 %v1469_v4, 0.0  ;;  %v1502_v24 = vmax.f32 %v1470_v15, 0.0  ;;  %v1503_v25 = vmax.f32 %v1471_v51, 0.0 }
 0x32b   : > { %1560 = vst [vmem:[#allocation2] sm:$0xff] %v1496_v53  ;;  %v1400_v46 = vmul.f32 %v3078_v1, %v2932_v29  ;;  %v1401_v61 = vmul.f32 %v3078_v1, %v2938_v32  ;;  %v1402_v50 = vmul.f32 %v3078_v1, %v2944_v35  ;;  %v1403_v63 = vmul.f32 %v3078_v1, %v2950_v38 }
 0x32c   : > { %1561 = vst [vmem:[#allocation2 + $0x8] sm:$0xff] %v1497_v33  ;;  %v1404_v54 = vmul.f32 %v3078_v1, %v2956_v44  ;;  %v1405_v58 = vmul.f32 %v3078_v1, %v2962_v48  ;;  %v1406_v34 = vmul.f32 %v3078_v1, %v2968_v52  ;;  %v1407_v29 = vmul.f32 %v3078_v1, %v2974_v56 }
 0x32d   : > { %1562 = vst [vmem:[#allocation2 + $0x10] sm:$0xff] %v1498_v21  ;;  %v1436_v32 = vmul.f32 %v3087_v3, %v1400_v46  ;;  %v1437_v35 = vmul.f32 %v3087_v3, %v1401_v61  ;;  %v1438_v38 = vmul.f32 %v3087_v3, %v1402_v50  ;;  %v1439_v5 = vmul.f32 %v3087_v3, %v1403_v63 }
 0x32e   : > { %1563 = vst [vmem:[#allocation2 + $0x18] sm:$0xff] %v1499_v36  ;;  %v1440_v44 = vmul.f32 %v3087_v3, %v1404_v54  ;;  %v1441_v48 = vmul.f32 %v3087_v3, %v1405_v58  ;;  %v1442_v2 = vmul.f32 %v3087_v3, %v1406_v34  ;;  %v1443_v52 = vmul.f32 %v3087_v3, %v1407_v29 }
 0x32f   : > { %1564 = vst [vmem:[#allocation2 + $0x20] sm:$0xff] %v1500_v57  ;;  %v1472_v56 = vadd.f32 %v3106_v9, %v1436_v32  ;;  %v1473_v7 = vadd.f32 %v3106_v9, %v1437_v35  ;;  %v1474_v6 = vadd.f32 %v3106_v9, %v1438_v38  ;;  %v1475_v16 = vadd.f32 %v3106_v9, %v1439_v5 }
 0x330   : > { %1565 = vst [vmem:[#allocation2 + $0x28] sm:$0xff] %v1501_v39  ;;  %v1476_v37 = vadd.f32 %v3106_v9, %v1440_v44  ;;  %v1477_v8 = vadd.f32 %v3106_v9, %v1441_v48  ;;  %v1478_v10 = vadd.f32 %v3106_v9, %v1442_v2  ;;  %v1479_v12 = vadd.f32 %v3106_v9, %v1443_v52 }
 0x331   : > { %1566 = vst [vmem:[#allocation2 + $0x30] sm:$0xff] %v1502_v24  ;;  %v1504_v41 = vmax.f32 %v1472_v56, 0.0  ;;  %v1505_v45 = vmax.f32 %v1473_v7, 0.0  ;;  %v1506_v43 = vmax.f32 %v1474_v6, 0.0  ;;  %v1507_v20 = vmax.f32 %v1475_v16, 0.0 }
 0x332   : > { %1567 = vst [vmem:[#allocation2 + $0x38] sm:$0xff] %v1503_v25  ;;  %v1508_v11 = vmax.f32 %v1476_v37, 0.0  ;;  %v1509_v26 = vmax.f32 %v1477_v8, 0.0  ;;  %v1510_v23 = vmax.f32 %v1478_v10, 0.0  ;;  %v1511_v13 = vmax.f32 %v1479_v12, 0.0 }
 0x333   : > { %1568 = vst [vmem:[#allocation2 + $0x40] sm:$0xff] %v1504_v41  ;;  %v1408_v49 = vmul.f32 %v3078_v1, %v2980_v60  ;;  %v1409_v40 = vmul.f32 %v3078_v1, %v2986_v0  ;;  %v1410_v4 = vmul.f32 %v3078_v1, %v2992_v14  ;;  %v1411_v15 = vmul.f32 %v3078_v1, %v2998_v42 }
 0x334   : > { %1569 = vst [vmem:[#allocation2 + $0x48] sm:$0xff] %v1505_v45  ;;  %v1412_v51 = vmul.f32 %v3078_v1, %v3004_v18  ;;  %v1413_v53 = vmul.f32 %v3078_v1, %v3010_v47  ;;  %v1414_v33 = vmul.f32 %v3078_v1, %v3016_v27  ;;  %v1415_v60 = vmul.f32 %v3078_v1, %v3022_v30 }
 0x335   : > { %1570 = vst [vmem:[#allocation2 + $0x50] sm:$0xff] %v1506_v43  ;;  %v1444_v0 = vmul.f32 %v3087_v3, %v1408_v49  ;;  %v1445_v14 = vmul.f32 %v3087_v3, %v1409_v40  ;;  %v1446_v42 = vmul.f32 %v3087_v3, %v1410_v4  ;;  %v1447_v21 = vmul.f32 %v3087_v3, %v1411_v15 }
 0x336   : > { %1571 = vst [vmem:[#allocation2 + $0x58] sm:$0xff] %v1507_v20  ;;  %v1448_v18 = vmul.f32 %v3087_v3, %v1412_v51  ;;  %v1449_v47 = vmul.f32 %v3087_v3, %v1413_v53  ;;  %v1450_v36 = vmul.f32 %v3087_v3, %v1414_v33  ;;  %v1451_v27 = vmul.f32 %v3087_v3, %v1415_v60 }
 0x337   : > { %1572 = vst [vmem:[#allocation2 + $0x60] sm:$0xff] %v1508_v11  ;;  %v1480_v30 = vadd.f32 %v3106_v9, %v1444_v0  ;;  %v1481_v57 = vadd.f32 %v3106_v9, %v1445_v14  ;;  %v1482_v39 = vadd.f32 %v3106_v9, %v1446_v42  ;;  %v1483_v24 = vadd.f32 %v3106_v9, %v1447_v21 }
 0x338   : > { %1573 = vst [vmem:[#allocation2 + $0x68] sm:$0xff] %v1509_v26  ;;  %v1484_v25 = vadd.f32 %v3106_v9, %v1448_v18  ;;  %v1485_v46 = vadd.f32 %v3106_v9, %v1449_v47  ;;  %v1486_v61 = vadd.f32 %v3106_v9, %v1450_v36  ;;  %v1487_v50 = vadd.f32 %v3106_v9, %v1451_v27 }
 0x339   : > { %1574 = vst [vmem:[#allocation2 + $0x70] sm:$0xff] %v1510_v23  ;;  %v1512_v63 = vmax.f32 %v1480_v30, 0.0  ;;  %v1513_v54 = vmax.f32 %v1481_v57, 0.0  ;;  %v1514_v58 = vmax.f32 %v1482_v39, 0.0  ;;  %v1515_v34 = vmax.f32 %v1483_v24, 0.0 }
 0x33a   : > { %1575 = vst [vmem:[#allocation2 + $0x78] sm:$0xff] %v1511_v13  ;;  %v1516_v29 = vmax.f32 %v1484_v25, 0.0  ;;  %v1517_v32 = vmax.f32 %v1485_v46, 0.0  ;;  %v1518_v35 = vmax.f32 %v1486_v61, 0.0  ;;  %v1519_v38 = vmax.f32 %v1487_v50, 0.0 }
 0x33b   : > { %1576 = vst [vmem:[#allocation2 + $0x80] sm:$0xff] %v1512_v63  ;;  %v1416_v5 = vmul.f32 %v3078_v1, %v3032_v19  ;;  %v1417_v44 = vmul.f32 %v3078_v1, %v3026_v17  ;;  %v1418_v48 = vmul.f32 %v3078_v1, %v3036_v55  ;;  %v1419_v2 = vmul.f32 %v3078_v1, %v3042_v22 }
 0x33c   : > { %1577 = vst [vmem:[#allocation2 + $0x88] sm:$0xff] %v1513_v54  ;;  %v1420_v52 = vmul.f32 %v3078_v1, %v3050_v59  ;;  %v1421_v56 = vmul.f32 %v3078_v1, %v3058_v28  ;;  %v1422_v7 = vmul.f32 %v3078_v1, %v3064_v31  ;;  %v1423_v19 = vmul.f32 %v3078_v1, %v3070_v62 }
 0x33d   : > { %1578 = vst [vmem:[#allocation2 + $0x90] sm:$0xff] %v1514_v58  ;;  %v1452_v17 = vmul.f32 %v3087_v3, %v1416_v5  ;;  %v1453_v55 = vmul.f32 %v3087_v3, %v1417_v44  ;;  %v1454_v22 = vmul.f32 %v3087_v3, %v1418_v48  ;;  %v1455_v6 = vmul.f32 %v3087_v3, %v1419_v2 }
 0x33e   : > { %1579 = vst [vmem:[#allocation2 + $0x98] sm:$0xff] %v1515_v34  ;;  %v1456_v59 = vmul.f32 %v3087_v3, %v1420_v52  ;;  %v1457_v28 = vmul.f32 %v3087_v3, %v1421_v56  ;;  %v1458_v16 = vmul.f32 %v3087_v3, %v1422_v7  ;;  %v1459_v31 = vmul.f32 %v3087_v3, %v1423_v19 }
 0x33f   : > { %1580 = vst [vmem:[#allocation2 + $0xa0] sm:$0xff] %v1516_v29  ;;  %v1488_v62 = vadd.f32 %v3106_v9, %v1452_v17  ;;  %v1489_v1 = vadd.f32 %v3106_v9, %v1453_v55  ;;  %v1490_v37 = vadd.f32 %v3106_v9, %v1454_v22  ;;  %v1491_v8 = vadd.f32 %v3106_v9, %v1455_v6 }
 0x340   : > { %1581 = vst [vmem:[#allocation2 + $0xa8] sm:$0xff] %v1517_v32  ;;  %v1492_v10 = vadd.f32 %v3106_v9, %v1456_v59  ;;  %v1493_v12 = vadd.f32 %v3106_v9, %v1457_v28  ;;  %v1494_v41 = vadd.f32 %v3106_v9, %v1458_v16  ;;  %v1495_v45 = vadd.f32 %v3106_v9, %v1459_v31 }
 0x341   : > { %1582 = vst [vmem:[#allocation2 + $0xb0] sm:$0xff] %v1518_v35  ;;  %v1520_v3 = vmax.f32 %v1488_v62, 0.0  ;;  %v1521_v43 = vmax.f32 %v1489_v1, 0.0  ;;  %v1522_v20 = vmax.f32 %v1490_v37, 0.0  ;;  %v1523_v11 = vmax.f32 %v1491_v8, 0.0 }
 0x342   : > { %1583 = vst [vmem:[#allocation2 + $0xb8] sm:$0xff] %v1519_v38  ;;  %v1524_v26 = vmax.f32 %v1492_v10, 0.0  ;;  %v1525_v23 = vmax.f32 %v1493_v12, 0.0  ;;  %v1526_v13 = vmax.f32 %v1494_v41, 0.0  ;;  %v1527_v15 = vmax.f32 %v1495_v45, 0.0 }
 0x343   : > { %1584 = vst [vmem:[#allocation2 + $0xc0] sm:$0xff] %v1520_v3  ;;  %v1553_v49 = vmul.f32 0.0, %v1521_v43  ;;  %v1554_v40 = vmul.f32 0.0, %v1522_v20  ;;  %v1555_v4 = vmul.f32 0.0, %v1523_v11 }
 0x344   : > { %v1556_v51 = vmul.f32 0.0, %v1524_v26  ;;  %v1557_v53 = vmul.f32 0.0, %v1525_v23  ;;  %v1558_v33 = vmul.f32 0.0, %v1526_v13  ;;  %v1559_v9 = vmul.f32 0.0, %v1527_v15 }
 0x345   : > { %1585 = vst [vmem:[#allocation2 + $0xc8] sm:$0xff] %v1553_v49 }
 0x346   : > { %1586 = vst [vmem:[#allocation2 + $0xd0] sm:$0xff] %v1554_v40 }
 0x347   : > { %1587 = vst [vmem:[#allocation2 + $0xd8] sm:$0xff] %v1555_v4 }
 0x348   : > { %1588 = vst [vmem:[#allocation2 + $0xe0] sm:$0xff] %v1556_v51 }
 0x349   : > { %1589 = vst [vmem:[#allocation2 + $0xe8] sm:$0xff] %v1557_v53 }
 0x34a   : > { %1590 = vst [vmem:[#allocation2 + $0xf0] sm:$0xff] %v1558_v33 }
 0x34b   : > { %1591 = vst [vmem:[#allocation2 + $0xf8] sm:$0xff] %v1559_v9 }
 0x34c PF: > { %s3416_s0 = sld [smem:[#allocation17_spill]] }
 0x352   : > { %p1880_p7 = scmp.ne.s32.totalorder %s3416_s0, 2 }
 0x353   : > { %s3417_s11 = sld [smem:[#allocation27_spill]] (!%p1880_p7) }
 0x354   : > { %1595 = sbr.rel (%p1880_p7) target bundleno = 890 (0x37a), region = 92 }
 0x359   : > { %v1596_v60 = vld [vmem:[#allocation2] sm:$0xff]  ;;  %v1597_v0 = vld [vmem:[#allocation2 + $0x8] sm:$0xff]  ;;  %v1598_v14 = vld [vmem:[#allocation2 + $0x10] sm:$0xff] }
 0x35a   : > { %1628 = vst [vmem:[%s3417_s11] sm:$0xff] %v1596_v60  ;;  %v1599_v42 = vld [vmem:[#allocation2 + $0x18] sm:$0xff]  ;;  %v1600_v21 = vld [vmem:[#allocation2 + $0x20] sm:$0xff]  ;;  %v1601_v18 = vld [vmem:[#allocation2 + $0x28] sm:$0xff] }
 0x35b   : > { %1629 = vst [vmem:[%s3417_s11 + $0x8] sm:$0xff] %v1597_v0  ;;  %v1602_v47 = vld [vmem:[#allocation2 + $0x30] sm:$0xff]  ;;  %v1603_v36 = vld [vmem:[#allocation2 + $0x38] sm:$0xff]  ;;  %v1604_v27 = vld [vmem:[#allocation2 + $0x40] sm:$0xff] }
 0x35c   : > { %1630 = vst [vmem:[%s3417_s11 + $0x10] sm:$0xff] %v1598_v14  ;;  %v1605_v30 = vld [vmem:[#allocation2 + $0x48] sm:$0xff]  ;;  %v1606_v57 = vld [vmem:[#allocation2 + $0x50] sm:$0xff]  ;;  %v1607_v39 = vld [vmem:[#allocation2 + $0x58] sm:$0xff] }
 0x35d   : > { %1631 = vst [vmem:[%s3417_s11 + $0x18] sm:$0xff] %v1599_v42  ;;  %v1608_v24 = vld [vmem:[#allocation2 + $0x60] sm:$0xff]  ;;  %v1609_v25 = vld [vmem:[#allocation2 + $0x68] sm:$0xff]  ;;  %v1610_v46 = vld [vmem:[#allocation2 + $0x70] sm:$0xff] }
 0x35e   : > { %1632 = vst [vmem:[%s3417_s11 + $0x20] sm:$0xff] %v1600_v21  ;;  %v1611_v61 = vld [vmem:[#allocation2 + $0x78] sm:$0xff]  ;;  %v1612_v50 = vld [vmem:[#allocation2 + $0x80] sm:$0xff]  ;;  %v1613_v63 = vld [vmem:[#allocation2 + $0x88] sm:$0xff] }
 0x35f   : > { %1633 = vst [vmem:[%s3417_s11 + $0x28] sm:$0xff] %v1601_v18  ;;  %v1614_v54 = vld [vmem:[#allocation2 + $0x90] sm:$0xff]  ;;  %v1615_v58 = vld [vmem:[#allocation2 + $0x98] sm:$0xff]  ;;  %v1616_v34 = vld [vmem:[#allocation2 + $0xa0] sm:$0xff] }
 0x360   : > { %1634 = vst [vmem:[%s3417_s11 + $0x30] sm:$0xff] %v1602_v47  ;;  %v1617_v29 = vld [vmem:[#allocation2 + $0xa8] sm:$0xff]  ;;  %v1618_v32 = vld [vmem:[#allocation2 + $0xb0] sm:$0xff]  ;;  %v1619_v35 = vld [vmem:[#allocation2 + $0xb8] sm:$0xff] }
 0x361   : > { %1635 = vst [vmem:[%s3417_s11 + $0x38] sm:$0xff] %v1603_v36  ;;  %v1620_v38 = vld [vmem:[#allocation2 + $0xc0] sm:$0xff]  ;;  %v1621_v5 = vld [vmem:[#allocation2 + $0xc8] sm:$0xff]  ;;  %v1622_v44 = vld [vmem:[#allocation2 + $0xd0] sm:$0xff] }
 0x362   : > { %1636 = vst [vmem:[%s3417_s11 + $0x40] sm:$0xff] %v1604_v27  ;;  %v1623_v48 = vld [vmem:[#allocation2 + $0xd8] sm:$0xff]  ;;  %v1624_v2 = vld [vmem:[#allocation2 + $0xe0] sm:$0xff]  ;;  %v1625_v52 = vld [vmem:[#allocation2 + $0xe8] sm:$0xff] }
 0x363   : > { %1637 = vst [vmem:[%s3417_s11 + $0x48] sm:$0xff] %v1605_v30  ;;  %v1626_v56 = vld [vmem:[#allocation2 + $0xf0] sm:$0xff]  ;;  %v1627_v7 = vld [vmem:[#allocation2 + $0xf8] sm:$0xff] }
 0x364   : > { %1638 = vst [vmem:[%s3417_s11 + $0x50] sm:$0xff] %v1606_v57 }
 0x365   : > { %1639 = vst [vmem:[%s3417_s11 + $0x58] sm:$0xff] %v1607_v39 }
 0x366   : > { %1640 = vst [vmem:[%s3417_s11 + $0x60] sm:$0xff] %v1608_v24 }
 0x367   : > { %1641 = vst [vmem:[%s3417_s11 + $0x68] sm:$0xff] %v1609_v25 }
 0x368   : > { %1642 = vst [vmem:[%s3417_s11 + $0x70] sm:$0xff] %v1610_v46 }
 0x369   : > { %1643 = vst [vmem:[%s3417_s11 + $0x78] sm:$0xff] %v1611_v61 }
 0x36a   : > { %1644 = vst [vmem:[%s3417_s11 + $0x80] sm:$0xff] %v1612_v50 }
 0x36b   : > { %1645 = vst [vmem:[%s3417_s11 + $0x88] sm:$0xff] %v1613_v63 }
 0x36c   : > { %1646 = vst [vmem:[%s3417_s11 + $0x90] sm:$0xff] %v1614_v54 }
 0x36d   : > { %1647 = vst [vmem:[%s3417_s11 + $0x98] sm:$0xff] %v1615_v58 }
 0x36e   : > { %1648 = vst [vmem:[%s3417_s11 + $0xa0] sm:$0xff] %v1616_v34 }
 0x36f   : > { %1649 = vst [vmem:[%s3417_s11 + $0xa8] sm:$0xff] %v1617_v29 }
 0x370   : > { %1650 = vst [vmem:[%s3417_s11 + $0xb0] sm:$0xff] %v1618_v32 }
 0x371   : > { %1651 = vst [vmem:[%s3417_s11 + $0xb8] sm:$0xff] %v1619_v35 }
 0x372   : > { %1652 = vst [vmem:[%s3417_s11 + $0xc0] sm:$0xff] %v1620_v38 }
 0x373   : > { %1653 = vst [vmem:[%s3417_s11 + $0xc8] sm:$0xff] %v1621_v5 }
 0x374   : > { %1654 = vst [vmem:[%s3417_s11 + $0xd0] sm:$0xff] %v1622_v44 }
 0x375   : > { %1655 = vst [vmem:[%s3417_s11 + $0xd8] sm:$0xff] %v1623_v48 }
 0x376   : > { %1656 = vst [vmem:[%s3417_s11 + $0xe0] sm:$0xff] %v1624_v2 }
 0x377   : > { %1657 = vst [vmem:[%s3417_s11 + $0xe8] sm:$0xff] %v1625_v52 }
 0x378   : > { %1658 = vst [vmem:[%s3417_s11 + $0xf0] sm:$0xff] %v1626_v56 }
 0x379   : > { %1659 = vst [vmem:[%s3417_s11 + $0xf8] sm:$0xff] %v1627_v7 }
 0x37a PF: > { %s20_s9 = sadd.s32 1, %s2454_s9   ;;  %s3419_s27 = sld [smem:[#allocation18_spill]] }
 0x37b   : > { %p3317_p5 = scmp.ge.s32.totalorder %s20_s9, 14   ;;  %s3420_s28 = sld [smem:[#allocation19_spill]] }
 0x37c   : > { %s3421_s30 = sld [smem:[#allocation20_spill]]  ;;  %s3425_s21 = smov %s2410_s22 }
 0x37d   : > { %s3422_s7 = sld [smem:[#allocation21_spill]]  ;;  %s3426_s22 = smov %s2414_s23 }
 0x37e   : > { %s3423_s13 = sld [smem:[#allocation22_spill]]  ;;  %s3427_s23 = smov %s2635_s18 }
 0x37f   : > { %s3428_s24 = smov %s2422_s25  ;;  %s3429_s25 = smov %s2426_s26 }
 0x380   : > { %s3430_s26 = smov %s2595_s6  ;;  %s3431_s29 = smov %s2450_s8 }
 0x381   :  { %19 = sbr.rel (!%p3317_p5) target bundleno = 15 (0xf), region = 150 }
 0x384   : > { %s3432_s8 = smov %s3423_s13 }
 0x386   :  { %1671 = vsyncpa [#allocation6], 1 }
 0x387   :  { %1673 = vsyncpa [#allocation6 + $0x1], 1 }
 0x388   :  { %1674 = vsyncpa [#allocation8], 1 }

</bundles_post_ra>
